<compile_context>
chip_gen: v6e
topology: v6e:2x2x1
jax: 0.10.0
libtpu: 0.0.40
codegen_flags: <defaults>
</compile_context>

<pallas_src>
import functools

import jax
import jax.numpy as jnp
from jax.experimental import pallas as pl
from jax.experimental.pallas import tpu as pltpu

LATENT_DIMS = 2
IN_FEATURES = 784          # 28 * 28
IN_PAD = 896               # 7 * 128 : lane/K-aligned feature axis
HIDDEN = 512


def _ceil_div(a, b):
    return -(-a // b)


def _round_up(x, m):
    return _ceil_div(x, m) * m


def _choose_tiling(batch, block_b):
    """Static choice of (batch_tile, padded_batch).

    Two regimes:
      * single grid step: tb == b_pad == round_up(B, 16).  Minimal padding;
        blocks equal the full array dims so no (8,128) divisibility issues.
      * even number of grid steps with tb a multiple of 128: keeps the batch
        (lane) axis of x/eps/z/kl 128-aligned (unmasked stores) and gives
        v7x's two TensorCores an even share via the "parallel" batch axis.
    The even multi-step tiling is preferred unless it costs >25% extra padded
    rows (the kernel is HBM-bound on x, so padded rows are wasted bandwidth).
    """
    tb_single = max(16, _round_up(batch, 16))
    n0 = max(2, 2 * _ceil_div(batch, 2 * block_b))
    best_tb, best_pad = None, None
    for n in range(n0, n0 + 9, 2):                 # small search: minimize padding
        tb_c = max(128, _round_up(_ceil_div(batch, n), 128))
        pad_c = n * tb_c
        if best_pad is None or pad_c < best_pad:
            best_tb, best_pad = tb_c, pad_c
    if batch > block_b or best_pad <= 1.25 * tb_single:
        return best_tb, best_pad
    return tb_single, tb_single


def _encoder_kernel(x_ref, w1_ref, b1_ref, w23_ref, b23_ref, eps_ref,
                    z_ref, kl_ref):
    # Batch lives on the lane axis everywhere (lane-dense loads/stores).
    #   x_ref   : (IN_PAD, tb)        bf16   streamed per grid step
    #   w1_ref  : (HIDDEN, IN_PAD)    bf16   VMEM-resident (constant index map)
    #   b1_ref  : (HIDDEN, 1)         f32    resident
    #   w23_ref : (2L, HIDDEN)        bf16   fused [linear2; linear3], resident
    #   b23_ref : (2L, 1)             f32    resident
    #   eps_ref : (L, tb)             f32
    #   z_ref   : (L, tb)             f32
    #   kl_ref  : (1, tb)             f32    per-sample KL partial
    h = jnp.dot(w1_ref[...], x_ref[...],
                preferred_element_type=jnp.float32)            # (HIDDEN, tb) f32
    h = jnp.maximum(h + b1_ref[...], 0.0)                      # relu, f32

    out = jnp.dot(w23_ref[...], h.astype(jnp.bfloat16),
                  preferred_element_type=jnp.float32) + b23_ref[...]   # (2L, tb)
    mu = out[:LATENT_DIMS, :]                                  # (L, tb)
    pre = out[LATENT_DIMS:, :]                                 # log(sigma)
    sigma = jnp.exp(pre)

    # Reparameterization: z = mu + sigma * eps   (eps ~ N(0,1), sampled outside)
    z_ref[...] = mu + sigma * eps_ref[...]

    # Per-sample KL partial: sum_latent(sigma^2 + mu^2 - log(sigma) - 1/2)
    kl_ref[...] = jnp.sum(sigma * sigma + mu * mu - pre - 0.5,
                          axis=0, keepdims=True)


def prepare_encoder_params(params):
    """One-time weight prep: fuse linear2|linear3, pad the feature axis to
    IN_PAD, cast MXU operands to bf16.  Call once and reuse across forward
    calls (hoists ~0.8 MB of per-call XLA weight traffic out of the hot path).
    Weights are expected in torch nn.Linear layout: w = (out_features, in_features)."""
    w1, b1, w2, b2, w3, b3 = params
    w1p = jnp.pad(w1.astype(jnp.float32),
                  ((0, 0), (0, IN_PAD - IN_FEATURES))).astype(jnp.bfloat16)   # (H, IN_PAD)
    w23 = jnp.concatenate([w2, w3], axis=0).astype(jnp.bfloat16)              # (2L, H)
    b1c = b1.reshape(HIDDEN, 1).astype(jnp.float32)
    b23c = jnp.concatenate([b2, b3], axis=0).reshape(2 * LATENT_DIMS, 1)
    return w1p, b1c, w23, b23c.astype(jnp.float32)


@functools.partial(jax.jit, static_argnames=("block_b",))
def variational_encoder_forward(x_nchw, prepared, eps, *, block_b=512):
    """x_nchw: (B, 1, 28, 28) float32.  Returns (z (B, latent) f32, kl scalar)."""
    w1p, b1c, w23, b23c = prepared
    B = x_nchw.shape[0]
    x_flat = x_nchw.reshape(B, -1).astype(jnp.float32)
    assert x_flat.shape[1] == IN_FEATURES

    tb, b_pad = _choose_tiling(B, block_b)

    # Batch on the lane axis: transpose, pad features -> IN_PAD and batch
    # -> b_pad (zeros), cast MXU operand to bf16.  One fused XLA pass over x.
    x_t = jnp.pad(x_flat.T, ((0, IN_PAD - IN_FEATURES),
                             (0, b_pad - B))).astype(jnp.bfloat16)        # (IN_PAD, b_pad)
    eps_t = jnp.pad(eps.astype(jnp.float32).T, ((0, 0), (0, b_pad - B)))  # (L, b_pad)

    grid = (b_pad // tb,)
    z_t, kl_cols = pl.pallas_call(
        _encoder_kernel,
        out_shape=(
            jax.ShapeDtypeStruct((LATENT_DIMS, b_pad), jnp.float32),
            jax.ShapeDtypeStruct((1, b_pad), jnp.float32),
        ),
        grid=grid,
        in_specs=[
            pl.BlockSpec((IN_PAD, tb), lambda i: (0, i)),               # x (streamed)
            pl.BlockSpec((HIDDEN, IN_PAD), lambda i: (0, 0)),           # w1 (resident)
            pl.BlockSpec((HIDDEN, 1), lambda i: (0, 0)),                # b1 (resident)
            pl.BlockSpec((2 * LATENT_DIMS, HIDDEN), lambda i: (0, 0)),  # w2|w3 (resident)
            pl.BlockSpec((2 * LATENT_DIMS, 1), lambda i: (0, 0)),       # b2|b3 (resident)
            pl.BlockSpec((LATENT_DIMS, tb), lambda i: (0, i)),          # eps
        ],
        out_specs=(
            pl.BlockSpec((LATENT_DIMS, tb), lambda i: (0, i)),          # z (lane-dense)
            pl.BlockSpec((1, tb), lambda i: (0, i)),                    # KL partial
        ),
        compiler_params=pltpu.CompilerParams(
            dimension_semantics=("parallel",)),
    )(x_t, w1p, b1c, w23, b23c, eps_t)

    # Drop padded samples, transpose the tiny z back, finish the KL reduction.
    z = z_t[:, :B].T
    kl = jnp.sum(kl_cols[0, :B])
    return z, kl


def init_params(key):
    """Mirrors nn.Linear default init (uniform +-1/sqrt(fan_in)); weights in
    torch (out_features, in_features) layout."""
    k1, k2, k3, k4, k5, k6 = jax.random.split(key, 6)

    def lin(kw, kb, fan_in, fan_out):
        bound = 1.0 / jnp.sqrt(jnp.float32(fan_in))
        w = jax.random.uniform(kw, (fan_out, fan_in), jnp.float32, -bound, bound)
        b = jax.random.uniform(kb, (fan_out,), jnp.float32, -bound, bound)
        return w, b

    w1, b1 = lin(k1, k2, IN_FEATURES, HIDDEN)
    w2, b2 = lin(k3, k4, HIDDEN, LATENT_DIMS)
    w3, b3 = lin(k5, k6, HIDDEN, LATENT_DIMS)
    return (w1, b1, w2, b2, w3, b3)


def _reference_forward(x_nchw, params, eps):
    """Pure-JAX reference of the PyTorch module (f32)."""
    w1, b1, w2, b2, w3, b3 = params
    x = x_nchw.reshape(x_nchw.shape[0], -1)
    h = jax.nn.relu(x @ w1.T + b1)
    mu = h @ w2.T + b2
    sigma = jnp.exp(h @ w3.T + b3)
    z = mu + sigma * eps
    kl = jnp.sum(sigma ** 2 + mu ** 2 - jnp.log(sigma) - 0.5)
    return z, kl


if __name__ == "__main__":
    key = jax.random.PRNGKey(0)
    k_param, k_x, k_eps = jax.random.split(key, 3)

    B = 2
    x = jax.random.normal(k_x, (B, 1, 28, 28), jnp.float32)        # NCHW
    eps = jax.random.normal(k_eps, (B, LATENT_DIMS), jnp.float32)  # N(0,1).sample(mu.shape)

    params = init_params(k_param)
    prepared = prepare_encoder_params(params)      # one-time weight prep (hoisted)

    z, kl = variational_encoder_forward(x, prepared, eps)
    jax.block_until_ready((z, kl))

    assert z.shape == (B, LATENT_DIMS) and z.dtype == jnp.float32
    assert kl.shape == () and bool(jnp.isfinite(kl))

    # Loose tolerance: bf16 MXU operands vs f32 reference.
    z_exp, kl_exp = _reference_forward(x, params, eps)
    assert bool(jnp.allclose(z, z_exp, rtol=1e-1, atol=1e-1))
    assert bool(jnp.allclose(kl, kl_exp, rtol=1e-1, atol=1e-1))

    print("KERNEL_OK")
</pallas_src>

<mosaic_0001>
module attributes {stable_mosaic.version = 11 : i64} {
  func.func @_encoder_kernel(%arg0: i32, %arg1: memref<896x16xbf16, #tpu.memory_space<vmem>>, %arg2: memref<512x896xbf16, #tpu.memory_space<vmem>>, %arg3: memref<512x1xf32, #tpu.memory_space<vmem>>, %arg4: memref<4x512xbf16, #tpu.memory_space<vmem>>, %arg5: memref<4x1xf32, #tpu.memory_space<vmem>>, %arg6: memref<2x16xf32, #tpu.memory_space<vmem>>, %arg7: memref<2x16xf32, #tpu.memory_space<vmem>>, %arg8: memref<1x16xf32, #tpu.memory_space<vmem>>) attributes {dimension_semantics = [#tpu.dimension_semantics<parallel>], iteration_bounds = array<i64: 1>, scalar_prefetch = 0 : i64, scratch_operands = 0 : i64, tpu.core_type = #tpu.core_type<tc>, window_params = [{transform_indices = @transform_0, window_bounds = array<i64: 896, 16>}, {pipeline_mode = #tpu.pipeline_mode<synchronous>, transform_indices = @transform_1, window_bounds = array<i64: 512, 896>}, {pipeline_mode = #tpu.pipeline_mode<synchronous>, transform_indices = @transform_2, window_bounds = array<i64: 512, 1>}, {pipeline_mode = #tpu.pipeline_mode<synchronous>, transform_indices = @transform_3, window_bounds = array<i64: 4, 512>}, {pipeline_mode = #tpu.pipeline_mode<synchronous>, transform_indices = @transform_4, window_bounds = array<i64: 4, 1>}, {transform_indices = @transform_5, window_bounds = array<i64: 2, 16>}, {transform_indices = @transform_6, window_bounds = array<i64: 2, 16>}, {transform_indices = @transform_7, window_bounds = array<i64: 1, 16>}]} {
    %c0 = arith.constant 0 : index
    %c0_0 = arith.constant 0 : index
    %0 = vector.load %arg2[%c0, %c0_0] : memref<512x896xbf16, #tpu.memory_space<vmem>>, vector<512x896xbf16>
    %c0_1 = arith.constant 0 : index
    %c0_2 = arith.constant 0 : index
    %1 = vector.load %arg1[%c0_1, %c0_2] : memref<896x16xbf16, #tpu.memory_space<vmem>>, vector<896x16xbf16>
    %cst = arith.constant dense<0.000000e+00> : vector<512x16xf32>
    %2 = tpu.matmul %0, %1, %cst {dimension_numbers = #tpu.dot_dimension_numbers<[1], [0], [0], [1], [0, 0, 1, 1], [], []>} : vector<512x896xbf16>, vector<896x16xbf16>, vector<512x16xf32> -> vector<512x16xf32>
    %c0_3 = arith.constant 0 : index
    %c0_4 = arith.constant 0 : index
    %3 = vector.load %arg3[%c0_3, %c0_4] : memref<512x1xf32, #tpu.memory_space<vmem>>, vector<512x1xf32>
    %4 = vector.broadcast %3 : vector<512x1xf32> to vector<512x16xf32>
    %5 = arith.addf %2, %4 : vector<512x16xf32>
    %cst_5 = arith.constant 0.000000e+00 : f32
    %6 = vector.broadcast %cst_5 : f32 to vector<512x16xf32>
    %7 = arith.maximumf %5, %6 : vector<512x16xf32>
    %c0_6 = arith.constant 0 : index
    %c0_7 = arith.constant 0 : index
    %8 = vector.load %arg4[%c0_6, %c0_7] : memref<4x512xbf16, #tpu.memory_space<vmem>>, vector<4x512xbf16>
    %9 = arith.truncf %7 : vector<512x16xf32> to vector<512x16xbf16>
    %cst_8 = arith.constant dense<0.000000e+00> : vector<4x16xf32>
    %10 = tpu.matmul %8, %9, %cst_8 {dimension_numbers = #tpu.dot_dimension_numbers<[1], [0], [0], [1], [0, 0, 1, 1], [], []>} : vector<4x512xbf16>, vector<512x16xbf16>, vector<4x16xf32> -> vector<4x16xf32>
    %c0_9 = arith.constant 0 : index
    %c0_10 = arith.constant 0 : index
    %11 = vector.load %arg5[%c0_9, %c0_10] : memref<4x1xf32, #tpu.memory_space<vmem>>, vector<4x1xf32>
    %12 = vector.broadcast %11 : vector<4x1xf32> to vector<4x16xf32>
    %13 = arith.addf %10, %12 : vector<4x16xf32>
    %14 = vector.extract_strided_slice %13 {offsets = [0, 0], sizes = [2, 16], strides = [1, 1]} : vector<4x16xf32> to vector<2x16xf32>
    %15 = vector.extract_strided_slice %13 {offsets = [2, 0], sizes = [2, 16], strides = [1, 1]} : vector<4x16xf32> to vector<2x16xf32>
    %16 = math.exp %15 : vector<2x16xf32>
    %c0_11 = arith.constant 0 : index
    %c0_12 = arith.constant 0 : index
    %17 = vector.load %arg6[%c0_11, %c0_12] : memref<2x16xf32, #tpu.memory_space<vmem>>, vector<2x16xf32>
    %18 = arith.mulf %16, %17 : vector<2x16xf32>
    %19 = arith.addf %14, %18 : vector<2x16xf32>
    %c0_13 = arith.constant 0 : index
    %c0_14 = arith.constant 0 : index
    %20 = vector.load %arg7[%c0_13, %c0_14] : memref<2x16xf32, #tpu.memory_space<vmem>>, vector<2x16xf32>
    tpu.vector_store %arg7[%c0_13, %c0_14], %19 {strides = array<i32>} : memref<2x16xf32, #tpu.memory_space<vmem>>, vector<2x16xf32>,
    %21 = arith.mulf %16, %16 : vector<2x16xf32>
    %22 = arith.mulf %14, %14 : vector<2x16xf32>
    %23 = arith.addf %21, %22 : vector<2x16xf32>
    %24 = arith.subf %23, %15 : vector<2x16xf32>
    %cst_15 = arith.constant 5.000000e-01 : f32
    %25 = vector.broadcast %cst_15 : f32 to vector<2x16xf32>
    %26 = arith.subf %24, %25 : vector<2x16xf32>
    %cst_16 = arith.constant dense<0.000000e+00> : vector<16xf32>
    %27 = vector.multi_reduction <add>, %26, %cst_16 [0] : vector<2x16xf32> to vector<16xf32>
    %28 = vector.shape_cast %27 : vector<16xf32> to vector<1x16xf32>
    %c0_17 = arith.constant 0 : index
    %c0_18 = arith.constant 0 : index
    %29 = vector.load %arg8[%c0_17, %c0_18] : memref<1x16xf32, #tpu.memory_space<vmem>>, vector<1x16xf32>
    tpu.vector_store %arg8[%c0_17, %c0_18], %28 {strides = array<i32>} : memref<1x16xf32, #tpu.memory_space<vmem>>, vector<1x16xf32>,
    return
  }
  func.func @transform_0(%arg0: i32) -> (i32, i32) {
    %c0_i32 = arith.constant 0 : i32
    %c0_i32_0 = arith.constant 0 : i32
    return %c0_i32, %arg0 : i32, i32
  }
  func.func @transform_1(%arg0: i32) -> (i32, i32) {
    %c0_i32 = arith.constant 0 : i32
    %c0_i32_0 = arith.constant 0 : i32
    %c0_i32_1 = arith.constant 0 : i32
    return %c0_i32, %c0_i32_0 : i32, i32
  }
  func.func @transform_2(%arg0: i32) -> (i32, i32) {
    %c0_i32 = arith.constant 0 : i32
    %c0_i32_0 = arith.constant 0 : i32
    %c0_i32_1 = arith.constant 0 : i32
    return %c0_i32, %c0_i32_0 : i32, i32
  }
  func.func @transform_3(%arg0: i32) -> (i32, i32) {
    %c0_i32 = arith.constant 0 : i32
    %c0_i32_0 = arith.constant 0 : i32
    %c0_i32_1 = arith.constant 0 : i32
    return %c0_i32, %c0_i32_0 : i32, i32
  }
  func.func @transform_4(%arg0: i32) -> (i32, i32) {
    %c0_i32 = arith.constant 0 : i32
    %c0_i32_0 = arith.constant 0 : i32
    %c0_i32_1 = arith.constant 0 : i32
    return %c0_i32, %c0_i32_0 : i32, i32
  }
  func.func @transform_5(%arg0: i32) -> (i32, i32) {
    %c0_i32 = arith.constant 0 : i32
    %c0_i32_0 = arith.constant 0 : i32
    return %c0_i32, %arg0 : i32, i32
  }
  func.func @transform_6(%arg0: i32) -> (i32, i32) {
    %c0_i32 = arith.constant 0 : i32
    %c0_i32_0 = arith.constant 0 : i32
    return %c0_i32, %arg0 : i32, i32
  }
  func.func @transform_7(%arg0: i32) -> (i32, i32) {
    %c0_i32 = arith.constant 0 : i32
    %c0_i32_0 = arith.constant 0 : i32
    return %c0_i32, %arg0 : i32, i32
  }
}

</mosaic_0001>

<bundles_post_ra>
// kernel: variational_encoder_forward.1
= control target key start
LH: loop header
LB: loop body
LE: loop exit
PB: predicated region body
PF: predicated region fallthrough
CT: control target
= control target key end

     0   :  { %v4528_v0 = vmov 0   ;;  %vm3638_vm0 = vcmask 123904   ;;  %vm3658_vm1 = vcmask 122880   ;;  %s6234_s0 = inlined_call_operand.vmem [shape: bf16[896,16], index: 0, kind: input, shape index: {}]   ;;  %s6235_s1 = inlined_call_operand.vmem [shape: bf16[512,896], index: 1, kind: input, shape index: {}]   ;;  %s6236_s2 = inlined_call_operand.vmem [shape: f32[512,1], index: 2, kind: input, shape index: {}]   ;;  %s6237_s4 = inlined_call_operand.vmem [shape: f32[4,1], index: 4, kind: input, shape index: {}]   ;;  %s6238_s3 = inlined_call_operand.vmem [shape: bf16[4,512], index: 3, kind: input, shape index: {}]   ;;  %s6239_s5 = inlined_call_operand.vmem [shape: f32[2,16], index: 5, kind: input, shape index: {}]   ;;  %s6240_s6 = inlined_call_operand.vmem [shape: f32[2,16], index: 6, kind: output, shape index: {0}]   ;;  %s6241_s7 = inlined_call_operand.vmem [shape: f32[1,16], index: 7, kind: output, shape index: {1}]  }
   0x1   :  { %2266 = vmatprep.subr.bf16.mxu0 %v4528_v0  ;;  %2555 = vmatprep.subr.bf16.mxu1 %v4528_v0  ;;  %v4149_v1 = vld [vmem:[%s6234_s0 + $0x38] sm:$0xff]   ;;  %v4151_v3 = vld [vmem:[%s6234_s0 + $0x30] sm:$0xff]   ;;  %v4153_v5 = vld [vmem:[%s6234_s0 + $0x28] sm:$0xff]  }
   0x2   :  { %v4150_v2 = vld [vmem:[%s6234_s0 + $0xb8] sm:$0xff]   ;;  %4147 = vset.pattern.permute.xlu0 %v4528_v0  ;;  %4148 = vset.pattern.permute.xlu1 %v4528_v0  ;;  %v4152_v4 = vld [vmem:[%s6234_s0 + $0xb0] sm:$0xff]   ;;  %v4154_v6 = vld [vmem:[%s6234_s0 + $0xa8] sm:$0xff]  }
   0x3   :  { %2267 = vmatpush1.bf16.msra.mxu0 %v4149_v1  ;;  %2556 = vmatpush1.bf16.msra.mxu1 %v4150_v2  ;;  %v4155_v7 = vld [vmem:[%s6234_s0 + $0x20] sm:$0xff]   ;;  %v4157_v9 = vld [vmem:[%s6234_s0 + $0x18] sm:$0xff]   ;;  %v4159_v11 = vld [vmem:[%s6234_s0 + $0x10] sm:$0xff]  }
   0x4   :  { %2268 = vmatprep.subr.bf16.mxu0 %v4528_v0  ;;  %2557 = vmatprep.subr.bf16.mxu1 %v4528_v0  ;;  %v4156_v8 = vld [vmem:[%s6234_s0 + $0xa0] sm:$0xff]   ;;  %v4158_v10 = vld [vmem:[%s6234_s0 + $0x98] sm:$0xff]   ;;  %v4160_v12 = vld [vmem:[%s6234_s0 + $0x90] sm:$0xff]  }
   0x5   :  { %v4161_v13 = vld [vmem:[%s6234_s0 + $0x8] sm:$0xff]   ;;  %v4163_v15 = vld [vmem:[%s6234_s0] sm:$0xff]   ;;  %v4165_v17 = vld [vmem:[%s6234_s0 + $0x78] sm:$0xff]  }
   0x6   :  { %v4162_v14 = vld [vmem:[%s6234_s0 + $0x88] sm:$0xff]   ;;  %v4164_v16 = vld [vmem:[%s6234_s0 + $0x80] sm:$0xff]   ;;  %v4166_v18 = vld [vmem:[%s6234_s0 + $0xf8] sm:$0xff]  }
   0x7   :  { %2269 = vmatpush1.bf16.msra.mxu0 %v4151_v3  ;;  %2558 = vmatpush1.bf16.msra.mxu1 %v4152_v4  ;;  %v4183_v19 = vld [vmem:[%s6235_s1 + $0x4] ss:$28 sps:$4 sm:$0xff]   ;;  %v4167_v20 = vld [vmem:[%s6234_s0 + $0x70] sm:$0xff]   ;;  %v4186_v21 = vld [vmem:[%s6235_s1 + $0xc] ss:$28 sps:$4 sm:$0xff]  }
   0x8   :  { %2270 = vmatprep.subr.bf16.mxu0 %v4528_v0  ;;  %2559 = vmatprep.subr.bf16.mxu1 %v4528_v0  ;;  %v4168_v22 = vld [vmem:[%s6234_s0 + $0xf0] sm:$0xff]   ;;  %v4169_v23 = vld [vmem:[%s6234_s0 + $0x68] sm:$0xff]   ;;  %v425_v27 = vld [vmem:[%s6236_s2 + $0xf8] sm:$0xff] }
   0x9   :  { %2298 = vmatprep.mubr.bf16.mxu0 %v4183_v19  ;;  %v4170_v24 = vld [vmem:[%s6234_s0 + $0xe8] sm:$0xff]   ;;  %2587 = vmatprep.mubr.bf16.mxu1 %v4186_v21  ;;  %v424_v25 = vld [vmem:[%s6236_s2 + $0xf0] sm:$0xff]  ;;  %v4171_v28 = vld [vmem:[%s6234_s0 + $0x60] sm:$0xff]  }
   0xa   :  { %610 = vperm.xlu0 %4147, %v424_v25   ;;  %v408_v26 = vld [vmem:[%s6236_s2 + $0x70] sm:$0xff]  ;;  %v409_v29 = vld [vmem:[%s6236_s2 + $0x78] sm:$0xff]  ;;  %v4172_v30 = vld [vmem:[%s6234_s0 + $0xe0] sm:$0xff]  }
   0xb   :  { %2271 = vmatpush1.bf16.msra.mxu0 %v4153_v5  ;;  %2560 = vmatpush1.bf16.msra.mxu1 %v4154_v6  ;;  %v422_v31 = vld [vmem:[%s6236_s2 + $0xe0] sm:$0xff]  ;;  %v4173_v32 = vld [vmem:[%s6234_s0 + $0x58] sm:$0xff]   ;;  %v423_v33 = vld [vmem:[%s6236_s2 + $0xe8] sm:$0xff] }
   0xc   :  { %2272 = vmatprep.subr.bf16.mxu0 %v4528_v0  ;;  %2561 = vmatprep.subr.bf16.mxu1 %v4528_v0  ;;  %v4174_v34 = vld [vmem:[%s6234_s0 + $0xd8] sm:$0xff]   ;;  %v406_v35 = vld [vmem:[%s6236_s2 + $0x60] sm:$0xff]  ;;  %v4175_v36 = vld [vmem:[%s6234_s0 + $0x50] sm:$0xff]  }
   0xd   :  { %530 = vperm.xlu1 %4148, %v408_v26   ;;  %v407_v37 = vld [vmem:[%s6236_s2 + $0x68] sm:$0xff]  ;;  %v4176_v38 = vld [vmem:[%s6234_s0 + $0xd0] sm:$0xff]   ;;  %v421_v41 = vld [vmem:[%s6236_s2 + $0xd8] sm:$0xff] }
   0xe   :  { %615 = vperm.xlu0 %4147, %v425_v27   ;;  %v420_v39 = vld [vmem:[%s6236_s2 + $0xd0] sm:$0xff]  ;;  %v4177_v40 = vld [vmem:[%s6234_s0 + $0x48] sm:$0xff]   ;;  %v4179_v44 = vld [vmem:[%s6234_s0 + $0x40] sm:$0xff]  }
   0xf   :  { %2273 = vmatpush1.bf16.msra.mxu0 %v4155_v7  ;;  %2562 = vmatpush1.bf16.msra.mxu1 %v4156_v8  ;;  %v4178_v42 = vld [vmem:[%s6234_s0 + $0xc8] sm:$0xff]   ;;  %v404_v43 = vld [vmem:[%s6236_s2 + $0x50] sm:$0xff]  ;;  %v405_v45 = vld [vmem:[%s6236_s2 + $0x58] sm:$0xff] }
  0x10   :  { %2274 = vmatprep.subr.bf16.mxu0 %v4528_v0  ;;  %2563 = vmatprep.subr.bf16.mxu1 %v4528_v0  ;;  %v4180_v46 = vld [vmem:[%s6234_s0 + $0xc0] sm:$0xff]   ;;  %v419_v50 = vld [vmem:[%s6236_s2 + $0xc8] sm:$0xff]  ;;  %v4187_v51 = vld [vmem:[%s6235_s1 + $0x3c] ss:$28 sps:$4 sm:$0xff]  }
  0x11   :  { %535 = vperm.xlu1 %4148, %v409_v29   ;;  %v418_v47 = vld [vmem:[%s6236_s2 + $0xc0] sm:$0xff]  ;;  %v4229_v54 = vld [vmem:[%s6234_s0 + $0x138] sm:$0xff]   ;;  %v403_v55 = vld [vmem:[%s6236_s2 + $0x48] sm:$0xff] }
  0x12   :  { %600 = vperm.xlu0 %4147, %v422_v31   ;;  %v4181_v48 = vld [vmem:[%s6235_s1] ss:$28 sps:$4 sm:$0xff]   ;;  %v4184_v49 = vld [vmem:[%s6235_s1 + $0x8] ss:$28 sps:$4 sm:$0xff]   ;;  %v4191_v56 = vld [vmem:[%s6235_s1 + $0x38] ss:$28 sps:$4 sm:$0xff]  }
  0x13   :  { %2275 = vmatpush1.bf16.msra.mxu0 %v4157_v9  ;;  %2564 = vmatpush1.bf16.msra.mxu1 %v4158_v10  ;;  %v4189_v52 = vld [vmem:[%s6235_s1 + $0x44] ss:$28 sps:$4 sm:$0xff]   ;;  %v416_v57 = vld [vmem:[%s6236_s2 + $0xb0] sm:$0xff]  ;;  %v417_v60 = vld [vmem:[%s6236_s2 + $0xb8] sm:$0xff] }
  0x14   :  { %2276 = vmatprep.subr.bf16.mxu0 %v4528_v0  ;;  %2565 = vmatprep.subr.bf16.mxu1 %v4528_v0  ;;  %v402_v53 = vld [vmem:[%s6236_s2 + $0x40] sm:$0xff]  ;;  %v4193_v59 = vld [vmem:[%s6235_s1 + $0x74] ss:$28 sps:$4 sm:$0xff]   ;;  %v4195_v61 = vld [vmem:[%s6235_s1 + $0x7c] ss:$28 sps:$4 sm:$0xff]  }
  0x15   :  { %605 = vperm.xlu1 %4148, %v423_v33   ;;  %v4192_v58 = vld [vmem:[%s6235_s1 + $0x40] ss:$28 sps:$4 sm:$0xff]   ;;  %v4242_v62 = vld [vmem:[%s6234_s0 + $0x130] sm:$0xff]   ;;  %v415_v5 = vld [vmem:[%s6236_s2 + $0xa8] sm:$0xff] }
  0x16   :  { %520 = vperm.xlu0 %4147, %v406_v35   ;;  %v400_v63 = vld [vmem:[%s6236_s2 + $0x30] sm:$0xff]  ;;  %v401_v1 = vld [vmem:[%s6236_s2 + $0x38] sm:$0xff]  ;;  %v414_v4 = vld [vmem:[%s6236_s2 + $0xa0] sm:$0xff] }
  0x17   :  { %2277 = vmatpush1.bf16.msra.mxu0 %v4159_v11  ;;  %2566 = vmatpush1.bf16.msra.mxu1 %v4160_v12  ;;  %v4197_v2 = vld [vmem:[%s6235_s1 + $0x70] ss:$28 sps:$4 sm:$0xff]   ;;  %v4198_v3 = vld [vmem:[%s6235_s1 + $0x78] ss:$28 sps:$4 sm:$0xff]   ;;  %v398_v9 = vld [vmem:[%s6236_s2 + $0x20] sm:$0xff] }
  0x18   :  { %2278 = vmatprep.subr.bf16.mxu0 %v4528_v0  ;;  %2567 = vmatprep.subr.bf16.mxu1 %v4528_v0  ;;  %v4255_v6 = vld [vmem:[%s6234_s0 + $0x128] sm:$0xff]   ;;  %v4201_v8 = vld [vmem:[%s6235_s1 + $0xb4] ss:$28 sps:$4 sm:$0xff]   ;;  %v4268_v12 = vld [vmem:[%s6234_s0 + $0x120] sm:$0xff]  }
  0x19   :  { %525 = vperm.xlu1 %4148, %v407_v37   ;;  %v4199_v7 = vld [vmem:[%s6235_s1 + $0xac] ss:$28 sps:$4 sm:$0xff]   ;;  %v397_v19 = vld [vmem:[%s6236_s2 + $0x18] sm:$0xff]  ;;  %v4213_v26 = vld [vmem:[%s6235_s1 + $0x124] ss:$28 sps:$4 sm:$0xff]  }
  0x1a   :  { %590 = vperm.xlu0 %4147, %v420_v39   ;;  %v399_v10 = vld [vmem:[%s6236_s2 + $0x28] sm:$0xff]  ;;  %v4209_v21 = vld [vmem:[%s6235_s1 + $0xe0] ss:$28 sps:$4 sm:$0xff]   ;;  %v456_v31 = vld [vmem:[%s6236_s2 + $0x1f0] sm:$0xff] }
  0x1b   :  { %2279 = vmatpush1.bf16.msra.mxu0 %v4161_v13  ;;  %2568 = vmatpush1.bf16.msra.mxu1 %v4162_v14  ;;  %v4203_v11 = vld [vmem:[%s6235_s1 + $0xa8] ss:$28 sps:$4 sm:$0xff]   ;;  %v412_v13 = vld [vmem:[%s6236_s2 + $0x90] sm:$0xff]  ;;  %v413_v14 = vld [vmem:[%s6236_s2 + $0x98] sm:$0xff] }
  0x1c   :  { %2280 = vmatprep.subr.bf16.mxu0 %v4528_v0  ;;  %2569 = vmatprep.subr.bf16.mxu1 %v4528_v0  ;;  %v4211_v25 = vld [vmem:[%s6235_s1 + $0x11c] ss:$28 sps:$4 sm:$0xff]   ;;  %v394_v27 = vld [vmem:[%s6236_s2] sm:$0xff]  ;;  %v395_v29 = vld [vmem:[%s6236_s2 + $0x8] sm:$0xff] }
  0x1d   :  { %595 = vperm.xlu1 %4148, %v421_v41   ;;  %v457_v33 = vld [vmem:[%s6236_s2 + $0x1f8] sm:$0xff]  ;;  %v454_v39 = vld [vmem:[%s6236_s2 + $0x1e0] sm:$0xff]  ;;  %v455_v41 = vld [vmem:[%s6236_s2 + $0x1e8] sm:$0xff] }
  0x1e   :  { %510 = vperm.xlu0 %4147, %v404_v43   ;;  %v4219_v35 = vld [vmem:[%s6235_s1 + $0x15c] ss:$28 sps:$4 sm:$0xff]   ;;  %v4223_v43 = vld [vmem:[%s6235_s1 + $0x18c] ss:$28 sps:$4 sm:$0xff]  }
  0x1f   :  { %2281 = vmatpush1.bf16.msra.mxu0 %v4163_v15  ;;  %2570 = vmatpush1.bf16.msra.mxu1 %v4164_v16  ;;  %v4204_v15 = vld [vmem:[%s6235_s1 + $0xb0] ss:$28 sps:$4 sm:$0xff]   ;;  %v4205_v16 = vld [vmem:[%s6235_s1 + $0xe4] ss:$28 sps:$4 sm:$0xff]   ;;  %v441_v37 = vld [vmem:[%s6236_s2 + $0x178] sm:$0xff] }
  0x20   :  { %2282 = vmatprep.subr.bf16.mxu0 %v4528_v0  ;;  %2571 = vmatprep.subr.bf16.mxu1 %v4528_v0 }
  0x21   :  { %515 = vperm.xlu1 %4148, %v405_v45   ;;  %v438_v45 = vld [vmem:[%s6236_s2 + $0x160] sm:$0xff] }
  0x22   :  { %580 = vperm.xlu0 %4147, %v418_v47   ;;  %v4320_v47 = vld [vmem:[%s6234_s0 + $0x100] sm:$0xff]  }
  0x23   :  { %2283 = vmatpush2.bf16.msra.mxu0 %v4165_v17  ;;  %2572 = vmatpush2.bf16.msra.mxu1 %v4166_v18  ;;  %v4207_v17 = vld [vmem:[%s6235_s1 + $0xec] ss:$28 sps:$4 sm:$0xff]   ;;  %v396_v18 = vld [vmem:[%s6236_s2 + $0x10] sm:$0xff] }
  0x24   :  { %2284 = vmatprep.subr.bf16.mxu0 %v4528_v0  ;;  %2573 = vmatprep.subr.bf16.mxu1 %v4528_v0 }
  0x25   :  { %585 = vperm.xlu1 %4148, %v419_v50   ;;  %v453_v50 = vld [vmem:[%s6236_s2 + $0x1d8] sm:$0xff] }
  0x26   :  { %500 = vperm.xlu0 %4147, %v402_v53   ;;  %v4232_v53 = vld [vmem:[%s6235_s1 + $0x1cc] ss:$28 sps:$4 sm:$0xff]  }
  0x27   :  { %2285 = vmatpush2.bf16.msra.mxu0 %v4167_v20  ;;  %2574 = vmatpush2.bf16.msra.mxu1 %v4168_v22  ;;  %v4281_v20 = vld [vmem:[%s6234_s0 + $0x118] sm:$0xff]   ;;  %v4210_v22 = vld [vmem:[%s6235_s1 + $0xe8] ss:$28 sps:$4 sm:$0xff]  }
  0x28   :  { %2286 = vmatprep.subr.bf16.mxu0 %v4528_v0  ;;  %2575 = vmatprep.subr.bf16.mxu1 %v4528_v0 }
  0x29   :  { %505 = vperm.xlu1 %4148, %v403_v55   ;;  %v437_v55 = vld [vmem:[%s6236_s2 + $0x158] sm:$0xff] }
  0x2a   :  { %570 = vperm.xlu0 %4147, %v416_v57   ;;  %v4333_v57 = vld [vmem:[%s6234_s0 + $0x178] sm:$0xff]  }
  0x2b   :  { %2287 = vmatpush2.bf16.msra.mxu0 %v4169_v23  ;;  %2576 = vmatpush2.bf16.msra.mxu1 %v4170_v24  ;;  %v410_v23 = vld [vmem:[%s6236_s2 + $0x80] sm:$0xff]  ;;  %v411_v24 = vld [vmem:[%s6236_s2 + $0x88] sm:$0xff] }
  0x2c   :  { %2288 = vmatprep.subr.bf16.mxu0 %v4528_v0  ;;  %2577 = vmatprep.subr.bf16.mxu1 %v4528_v0 }
  0x2d   :  { %575 = vperm.xlu1 %4148, %v417_v60   ;;  %v450_v60 = vld [vmem:[%s6236_s2 + $0x1c0] sm:$0xff] }
  0x2e   :  { %490 = vperm.xlu0 %4147, %v400_v63   ;;  %v434_v63 = vld [vmem:[%s6236_s2 + $0x140] sm:$0xff] }
  0x2f   :  { %2289 = vmatpush2.bf16.msra.mxu0 %v4171_v28  ;;  %2578 = vmatpush2.bf16.msra.mxu1 %v4172_v30  ;;  %v4294_v28 = vld [vmem:[%s6234_s0 + $0x110] sm:$0xff]  }
  0x30   :  { %2290 = vmatprep.subr.bf16.mxu0 %v4528_v0  ;;  %2579 = vmatprep.subr.bf16.mxu1 %v4528_v0  ;;  %v4215_v30 = vld [vmem:[%s6235_s1 + $0x118] ss:$28 sps:$4 sm:$0xff]  }
  0x31   :  { %495 = vperm.xlu1 %4148, %v401_v1   ;;  %v435_v1 = vld [vmem:[%s6236_s2 + $0x148] sm:$0xff] }
  0x32   :  { %560 = vperm.xlu0 %4147, %v414_v4   ;;  %v449_v4 = vld [vmem:[%s6236_s2 + $0x1b8] sm:$0xff] }
  0x33   :  { %2291 = vmatpush2.bf16.msra.mxu0 %v4173_v32  ;;  %2580 = vmatpush2.bf16.msra.mxu1 %v4174_v34  ;;  %v4216_v32 = vld [vmem:[%s6235_s1 + $0x120] ss:$28 sps:$4 sm:$0xff]   ;;  %v4217_v34 = vld [vmem:[%s6235_s1 + $0x154] ss:$28 sps:$4 sm:$0xff]  }
  0x34   :  { %2292 = vmatprep.subr.bf16.mxu0 %v4528_v0  ;;  %2581 = vmatprep.subr.bf16.mxu1 %v4528_v0 }
  0x35   :  { %565 = vperm.xlu1 %4148, %v415_v5   ;;  %v4241_v5 = vld [vmem:[%s6235_s1 + $0x200] ss:$28 sps:$4 sm:$0xff]  }
  0x36   :  { %480 = vperm.xlu0 %4147, %v398_v9   ;;  %v433_v9 = vld [vmem:[%s6236_s2 + $0x138] sm:$0xff] }
  0x37   :  { %2293 = vmatpush2.bf16.msra.mxu0 %v4175_v36  ;;  %2582 = vmatpush2.bf16.msra.mxu1 %v4176_v38  ;;  %v440_v36 = vld [vmem:[%s6236_s2 + $0x170] sm:$0xff]  ;;  %v4307_v38 = vld [vmem:[%s6234_s0 + $0x108] sm:$0xff]  }
  0x38   :  { %2294 = vmatprep.subr.bf16.mxu0 %v4528_v0  ;;  %2583 = vmatprep.subr.bf16.mxu1 %v4528_v0 }
  0x39   :  { %485 = vperm.xlu1 %4148, %v399_v10   ;;  %v446_v10 = vld [vmem:[%s6236_s2 + $0x1a0] sm:$0xff] }
  0x3a   :  { %550 = vperm.xlu0 %4147, %v412_v13   ;;  %v4248_v13 = vld [vmem:[%s6235_s1 + $0x238] ss:$28 sps:$4 sm:$0xff]  }
  0x3b   :  { %2295 = vmatpush2.bf16.msra.mxu0 %v4177_v40  ;;  %2584 = vmatpush2.bf16.msra.mxu1 %v4178_v42  ;;  %v4221_v40 = vld [vmem:[%s6235_s1 + $0x150] ss:$28 sps:$4 sm:$0xff]   ;;  %v4222_v42 = vld [vmem:[%s6235_s1 + $0x158] ss:$28 sps:$4 sm:$0xff]  }
  0x3c   :  { %2296 = vmatprep.subr.bf16.mxu0 %v4528_v0  ;;  %2585 = vmatprep.subr.bf16.mxu1 %v4528_v0 }
  0x3d   :  { %555 = vperm.xlu1 %4148, %v413_v14   ;;  %v4249_v14 = vld [vmem:[%s6235_s1 + $0x26c] ss:$28 sps:$4 sm:$0xff]  }
  0x3e   :  { %470 = vperm.xlu0 %4147, %v396_v18   ;;  %v4346_v18 = vld [vmem:[%s6234_s0 + $0x170] sm:$0xff]  }
  0x3f   :  { %2297 = vmatpush2.bf16.msra.mxu0 %v4179_v44  ;;  %2586 = vmatpush2.bf16.msra.mxu1 %v4180_v46  ;;  %v4225_v44 = vld [vmem:[%s6235_s1 + $0x194] ss:$28 sps:$4 sm:$0xff]   ;;  %v439_v46 = vld [vmem:[%s6236_s2 + $0x168] sm:$0xff] }
  0x40   :  { %2844 = vmatprep.subr.bf16.mxu0 %v4528_v0  ;;  %4113 = vmatprep.subr.bf16.mxu1 %v4528_v0 }
  0x41   :  { %475 = vperm.xlu1 %4148, %v397_v19   ;;  %v444_v19 = vld [vmem:[%s6236_s2 + $0x190] sm:$0xff] }
  0x42   :  { %2299 = vmatmul.mubr.bf16.vlgmr.msra.gmra.mxu0 %v4181_v48  ;;  %2588 = vmatmul.mubr.bf16.vlgmr.msra.gmra.mxu1 %v4184_v49  ;;  %v452_v48 = vld [vmem:[%s6236_s2 + $0x1d0] sm:$0xff]  ;;  %v4227_v49 = vld [vmem:[%s6235_s1 + $0x188] ss:$28 sps:$4 sm:$0xff]  }
  0x43   :  { %2306 = vmatprep.mubr.bf16.mxu0 %v4187_v51  ;;  %2595 = vmatprep.mubr.bf16.mxu1 %v4189_v52  ;;  %v4228_v51 = vld [vmem:[%s6235_s1 + $0x190] ss:$28 sps:$4 sm:$0xff]   ;;  %v4230_v52 = vld [vmem:[%s6235_s1 + $0x1c4] ss:$28 sps:$4 sm:$0xff]  }
  0x44   :  { %2845 = vmatpush1.bf16.msra.mxu0 %v4229_v54  ;;  %4129 = vmatpush1.bf16.msra.mxu1 %v4229_v54  ;;  %v436_v54 = vld [vmem:[%s6236_s2 + $0x150] sm:$0xff] }
  0x45   :  { %2846 = vmatprep.subr.bf16.mxu0 %v4528_v0  ;;  %4114 = vmatprep.subr.bf16.mxu1 %v4528_v0 }
  0x46   :  { %540 = vperm.xlu0 %4147, %v410_v23   ;;  %545 = vperm.xlu1 %4148, %v411_v24   ;;  %v4256_v23 = vld [vmem:[%s6235_s1 + $0x2a4] ss:$28 sps:$4 sm:$0xff]   ;;  %v4258_v24 = vld [vmem:[%s6235_s1 + $0x2ac] ss:$28 sps:$4 sm:$0xff]  }
  0x48   :  { %4130 = vmatpush1.bf16.msra.mxu1 %v4242_v62  ;;  %2847 = vmatpush1.bf16.msra.mxu0 %v4242_v62  ;;  %v4238_v62 = vld [vmem:[%s6235_s1 + $0x204] ss:$28 sps:$4 sm:$0xff]  }
  0x49   :  { %2848 = vmatprep.subr.bf16.mxu0 %v4528_v0  ;;  %4115 = vmatprep.subr.bf16.mxu1 %v4528_v0 }
  0x4a   :  { %2307 = vmatmul.mubr.bf16.gmra.mxu0 %v4191_v56  ;;  %2596 = vmatmul.mubr.bf16.gmra.mxu1 %v4192_v58  ;;  %v4234_v56 = vld [vmem:[%s6235_s1 + $0x1c0] ss:$28 sps:$4 sm:$0xff]   ;;  %v4235_v58 = vld [vmem:[%s6235_s1 + $0x1c8] ss:$28 sps:$4 sm:$0xff]  }
  0x4b   :  { %2314 = vmatprep.mubr.bf16.mxu0 %v4193_v59  ;;  %2603 = vmatprep.mubr.bf16.mxu1 %v4195_v61  ;;  %v4236_v59 = vld [vmem:[%s6235_s1 + $0x1fc] ss:$28 sps:$4 sm:$0xff]   ;;  %v451_v61 = vld [vmem:[%s6236_s2 + $0x1c8] sm:$0xff] }
  0x4c   :  { %4131 = vmatpush1.bf16.msra.mxu1 %v4255_v6  ;;  %2849 = vmatpush1.bf16.msra.mxu0 %v4255_v6  ;;  %v4243_v6 = vld [vmem:[%s6235_s1 + $0x234] ss:$28 sps:$4 sm:$0xff]  }
  0x4d   :  { %2850 = vmatprep.subr.bf16.mxu0 %v4528_v0  ;;  %4116 = vmatprep.subr.bf16.mxu1 %v4528_v0 }
  0x4e   :  { %460 = vperm.xlu0 %4147, %v394_v27   ;;  %465 = vperm.xlu1 %4148, %v395_v29   ;;  %v442_v27 = vld [vmem:[%s6236_s2 + $0x180] sm:$0xff]  ;;  %v443_v29 = vld [vmem:[%s6236_s2 + $0x188] sm:$0xff] }
  0x50   :  { %2851 = vmatpush1.bf16.msra.mxu0 %v4268_v12  ;;  %4132 = vmatpush1.bf16.msra.mxu1 %v4268_v12  ;;  %v447_v12 = vld [vmem:[%s6236_s2 + $0x1a8] sm:$0xff] }
  0x51   :  { %2852 = vmatprep.subr.bf16.mxu0 %v4528_v0  ;;  %4117 = vmatprep.subr.bf16.mxu1 %v4528_v0 }
  0x52   :  { %2315 = vmatmul.mubr.bf16.gmra.mxu0 %v4197_v2  ;;  %2604 = vmatmul.mubr.bf16.gmra.mxu1 %v4198_v3  ;;  %v448_v2 = vld [vmem:[%s6236_s2 + $0x1b0] sm:$0xff] }
  0x53   :  { %2322 = vmatprep.mubr.bf16.mxu0 %v4199_v7  ;;  %2611 = vmatprep.mubr.bf16.mxu1 %v4201_v8  ;;  %v4240_v3 = vld [vmem:[%s6235_s1 + $0x1f8] ss:$28 sps:$4 sm:$0xff]  }
  0x54   :  { %2853 = vmatpush1.bf16.msra.mxu0 %v4281_v20  ;;  %4133 = vmatpush1.bf16.msra.mxu1 %v4281_v20  ;;  %v4245_v7 = vld [vmem:[%s6235_s1 + $0x23c] ss:$28 sps:$4 sm:$0xff]   ;;  %v432_v8 = vld [vmem:[%s6236_s2 + $0x130] sm:$0xff]  ;;  %v4253_v20 = vld [vmem:[%s6235_s1 + $0x268] ss:$28 sps:$4 sm:$0xff]  }
  0x55   :  { %2854 = vmatprep.subr.bf16.mxu0 %v4528_v0  ;;  %4118 = vmatprep.subr.bf16.mxu1 %v4528_v0 }
  0x56   :  { %770 = vperm.xlu0 %4147, %v456_v31   ;;  %775 = vperm.xlu1 %4148, %v457_v33   ;;  %v4262_v31 = vld [vmem:[%s6235_s1 + $0x2dc] ss:$28 sps:$4 sm:$0xff]   ;;  %v426_v33 = vld [vmem:[%s6236_s2 + $0x100] sm:$0xff] }
  0x58   :  { %2855 = vmatpush1.bf16.msra.mxu0 %v4294_v28  ;;  %4134 = vmatpush1.bf16.msra.mxu1 %v4294_v28  ;;  %v4260_v28 = vld [vmem:[%s6235_s1 + $0x2a0] ss:$28 sps:$4 sm:$0xff]  }
  0x59   :  { %2856 = vmatprep.subr.bf16.mxu0 %v4528_v0  ;;  %4119 = vmatprep.subr.bf16.mxu1 %v4528_v0 }
  0x5a   :  { %2323 = vmatmul.mubr.bf16.gmra.mxu0 %v4203_v11  ;;  %2612 = vmatmul.mubr.bf16.gmra.mxu1 %v4204_v15  ;;  %v4247_v11 = vld [vmem:[%s6235_s1 + $0x230] ss:$28 sps:$4 sm:$0xff]  }
  0x5b   :  { %2330 = vmatprep.mubr.bf16.mxu0 %v4205_v16  ;;  %2619 = vmatprep.mubr.bf16.mxu1 %v4207_v17  ;;  %v4251_v15 = vld [vmem:[%s6235_s1 + $0x274] ss:$28 sps:$4 sm:$0xff]   ;;  %v430_v16 = vld [vmem:[%s6236_s2 + $0x120] sm:$0xff]  ;;  %v431_v17 = vld [vmem:[%s6236_s2 + $0x128] sm:$0xff] }
  0x5c   :  { %690 = vperm.xlu0 %4147, %v440_v36   ;;  %695 = vperm.xlu1 %4148, %v441_v37   ;;  %v4266_v36 = vld [vmem:[%s6235_s1 + $0x2d8] ss:$28 sps:$4 sm:$0xff]   ;;  %v4267_v37 = vld [vmem:[%s6235_s1 + $0x2e0] ss:$28 sps:$4 sm:$0xff]  }
  0x5d   :  { %2857 = vmatpush1.bf16.msra.mxu0 %v4307_v38  ;;  %4135 = vmatpush1.bf16.msra.mxu1 %v4307_v38  ;;  %v4269_v38 = vld [vmem:[%s6235_s1 + $0x314] ss:$28 sps:$4 sm:$0xff]  }
  0x5e   :  { %2858 = vmatprep.subr.bf16.mxu0 %v4528_v0  ;;  %4120 = vmatprep.subr.bf16.mxu1 %v4528_v0 }
  0x60   :  { %760 = vperm.xlu0 %4147, %v454_v39   ;;  %765 = vperm.xlu1 %4148, %v455_v41  }
  0x61   :  { %2859 = vmatpush1.bf16.msra.mxu0 %v4320_v47  ;;  %4136 = vmatpush1.bf16.msra.mxu1 %v4320_v47  ;;  %v4277_v47 = vld [vmem:[%s6235_s1 + $0x354] ss:$28 sps:$4 sm:$0xff]  }
  0x62   :  { %2331 = vmatmul.mubr.bf16.gmra.mxu0 %v4209_v21  ;;  %2620 = vmatmul.mubr.bf16.gmra.mxu1 %v4210_v22  ;;  %v445_v21 = vld [vmem:[%s6236_s2 + $0x198] sm:$0xff]  ;;  %v4254_v22 = vld [vmem:[%s6235_s1 + $0x270] ss:$28 sps:$4 sm:$0xff]  }
  0x63   :  { %2338 = vmatprep.mubr.bf16.mxu0 %v4211_v25  ;;  %2627 = vmatprep.mubr.bf16.mxu1 %v4213_v26  ;;  %v428_v25 = vld [vmem:[%s6236_s2 + $0x110] sm:$0xff]  ;;  %v429_v26 = vld [vmem:[%s6236_s2 + $0x118] sm:$0xff] }
  0x64   :  { %680 = vperm.xlu0 %4147, %v438_v45   ;;  %685 = vperm.xlu1 %4148, %v439_v46   ;;  %v4275_v45 = vld [vmem:[%s6235_s1 + $0x34c] ss:$28 sps:$4 sm:$0xff]   ;;  %v4372_v46 = vld [vmem:[%s6234_s0 + $0x160] sm:$0xff]  }
  0x65   :  { %2860 = vmatprep.subr.bf16.mxu0 %v4528_v0  ;;  %4121 = vmatprep.subr.bf16.mxu1 %v4528_v0 }
  0x66   :  { %2861 = vmatpush2.bf16.msra.mxu0 %v4333_v57  ;;  %4137 = vmatpush2.bf16.msra.mxu1 %v4333_v57 }
  0x67   :  { %2862 = vmatprep.subr.bf16.mxu0 %v4528_v0  ;;  %4122 = vmatprep.subr.bf16.mxu1 %v4528_v0 }
  0x68   :  { %750 = vperm.xlu0 %4147, %v452_v48   ;;  %755 = vperm.xlu1 %4148, %v453_v50   ;;  %v4379_v50 = vld [vmem:[%s6234_s0 + $0x158] sm:$0xff]  }
  0x6a   :  { %2339 = vmatmul.mubr.bf16.gmra.mxu0 %v4215_v30  ;;  %2628 = vmatmul.mubr.bf16.gmra.mxu1 %v4216_v32  ;;  %v4261_v30 = vld [vmem:[%s6235_s1 + $0x2a8] ss:$28 sps:$4 sm:$0xff]  }
  0x6b   :  { %2346 = vmatprep.mubr.bf16.mxu0 %v4217_v34  ;;  %2635 = vmatprep.mubr.bf16.mxu1 %v4219_v35  ;;  %v4264_v32 = vld [vmem:[%s6235_s1 + $0x2e4] ss:$28 sps:$4 sm:$0xff]   ;;  %v427_v34 = vld [vmem:[%s6236_s2 + $0x108] sm:$0xff] }
  0x6c   :  { %670 = vperm.xlu0 %4147, %v436_v54   ;;  %675 = vperm.xlu1 %4148, %v437_v55   ;;  %v4359_v35 = vld [vmem:[%s6234_s0 + $0x168] sm:$0xff]   ;;  %v4380_v55 = vld [vmem:[%s6234_s0 + $0x150] sm:$0xff]  }
  0x6d   :  { %2863 = vmatpush2.bf16.msra.mxu0 %v4346_v18  ;;  %4138 = vmatpush2.bf16.msra.mxu1 %v4346_v18  ;;  %v4305_v18 = vld [vmem:[%s6235_s1 + $0x428] ss:$28 sps:$4 sm:$0xff]  }
  0x6e   :  { %2864 = vmatprep.subr.bf16.mxu0 %v4528_v0  ;;  %4123 = vmatprep.subr.bf16.mxu1 %v4528_v0 }
  0x70   :  { %740 = vperm.xlu0 %4147, %v450_v60   ;;  %745 = vperm.xlu1 %4148, %v451_v61   ;;  %v4287_v61 = vld [vmem:[%s6235_s1 + $0x388] ss:$28 sps:$4 sm:$0xff]  }
  0x71   :  { %2865 = vmatpush2.bf16.msra.mxu0 %v4359_v35  ;;  %4139 = vmatpush2.bf16.msra.mxu1 %v4359_v35  ;;  %v4323_v35 = vld [vmem:[%s6235_s1 + $0x4dc] ss:$28 sps:$4 sm:$0xff]  }
  0x72   :  { %2347 = vmatmul.mubr.bf16.gmra.mxu0 %v4221_v40  ;;  %2636 = vmatmul.mubr.bf16.gmra.mxu1 %v4222_v42  ;;  %v4271_v40 = vld [vmem:[%s6235_s1 + $0x31c] ss:$28 sps:$4 sm:$0xff]   ;;  %v4273_v42 = vld [vmem:[%s6235_s1 + $0x310] ss:$28 sps:$4 sm:$0xff]  }
  0x73   :  { %2354 = vmatprep.mubr.bf16.mxu0 %v4223_v43  ;;  %2643 = vmatprep.mubr.bf16.mxu1 %v4225_v44  ;;  %v4274_v44 = vld [vmem:[%s6235_s1 + $0x318] ss:$28 sps:$4 sm:$0xff]  }
  0x74   :  { %660 = vperm.xlu0 %4147, %v434_v63   ;;  %665 = vperm.xlu1 %4148, %v435_v1   ;;  %v4388_v1 = vld [vmem:[%s6234_s0 + $0x140] sm:$0xff]  }
  0x75   :  { %2866 = vmatprep.subr.bf16.mxu0 %v4528_v0  ;;  %4124 = vmatprep.subr.bf16.mxu1 %v4528_v0 }
  0x76   :  { %2867 = vmatpush2.bf16.msra.mxu0 %v4372_v46  ;;  %4140 = vmatpush2.bf16.msra.mxu1 %v4372_v46 }
  0x77   :  { %2868 = vmatprep.subr.bf16.mxu0 %v4528_v0  ;;  %4125 = vmatprep.subr.bf16.mxu1 %v4528_v0 }
  0x78   :  { %730 = vperm.xlu0 %4147, %v448_v2   ;;  %735 = vperm.xlu1 %4148, %v449_v4   ;;  %v4290_v2 = vld [vmem:[%s6235_s1 + $0x3c4] ss:$28 sps:$4 sm:$0xff]  }
  0x7a   :  { %2355 = vmatmul.mubr.bf16.gmra.mxu0 %v4227_v49  ;;  %2644 = vmatmul.mubr.bf16.gmra.mxu1 %v4228_v51  ;;  %v4279_v51 = vld [vmem:[%s6235_s1 + $0x348] ss:$28 sps:$4 sm:$0xff]  }
  0x7b   :  { %2362 = vmatprep.mubr.bf16.mxu0 %v4230_v52  ;;  %2651 = vmatprep.mubr.bf16.mxu1 %v4232_v53  ;;  %v4280_v52 = vld [vmem:[%s6235_s1 + $0x350] ss:$28 sps:$4 sm:$0xff]   ;;  %v4282_v53 = vld [vmem:[%s6235_s1 + $0x384] ss:$28 sps:$4 sm:$0xff]  }
  0x7c   :  { %650 = vperm.xlu0 %4147, %v432_v8   ;;  %655 = vperm.xlu1 %4148, %v433_v9   ;;  %v5221_v9 = vld [vmem:[%s6234_s0 + $0x1b8] sm:$0xff]  }
  0x7d   :  { %2869 = vmatpush2.bf16.msra.mxu0 %v4379_v50  ;;  %4141 = vmatpush2.bf16.msra.mxu1 %v4379_v50  ;;  %v4331_v50 = vld [vmem:[%s6235_s1 + $0x508] ss:$28 sps:$4 sm:$0xff]  }
  0x7e   :  { %2870 = vmatprep.subr.bf16.mxu0 %v4528_v0  ;;  %4126 = vmatprep.subr.bf16.mxu1 %v4528_v0 }
  0x80   :  { %720 = vperm.xlu0 %4147, %v446_v10   ;;  %725 = vperm.xlu1 %4148, %v447_v12  }
  0x81   :  { %2871 = vmatpush2.bf16.msra.mxu0 %v4380_v55  ;;  %4142 = vmatpush2.bf16.msra.mxu1 %v4380_v55  ;;  %v4336_v55 = vld [vmem:[%s6235_s1 + $0x54c] ss:$28 sps:$4 sm:$0xff]  }
  0x82   :  { %2363 = vmatmul.mubr.bf16.gmra.mxu0 %v4234_v56  ;;  %2652 = vmatmul.mubr.bf16.gmra.mxu1 %v4235_v58  ;;  %v4284_v56 = vld [vmem:[%s6235_s1 + $0x38c] ss:$28 sps:$4 sm:$0xff]  }
  0x83   :  { %2370 = vmatprep.mubr.bf16.mxu0 %v4236_v59  ;;  %2659 = vmatprep.mubr.bf16.mxu1 %v4238_v62  ;;  %v4387_v58 = vld [vmem:[%s6234_s0 + $0x148] sm:$0xff]   ;;  %v4286_v59 = vld [vmem:[%s6235_s1 + $0x380] ss:$28 sps:$4 sm:$0xff]  }
  0x84   :  { %640 = vperm.xlu0 %4147, %v430_v16   ;;  %645 = vperm.xlu1 %4148, %v431_v17   ;;  %v4288_v62 = vld [vmem:[%s6235_s1 + $0x3bc] ss:$28 sps:$4 sm:$0xff]  }
  0x85   :  { %v5118_v39 = vpop.permute.xlu0 %610  ;;  %2872 = vmatprep.subr.bf16.mxu0 %v4528_v0  ;;  %4127 = vmatprep.subr.bf16.mxu1 %v4528_v0 }
  0x86   :  { %2873 = vmatpush2.bf16.msra.mxu0 %v4387_v58  ;;  %4143 = vmatpush2.bf16.msra.mxu1 %v4387_v58 }
  0x87   :  { %2874 = vmatprep.subr.bf16.mxu0 %v4528_v0  ;;  %4128 = vmatprep.subr.bf16.mxu1 %v4528_v0  ;;  %v4292_v0 = vld [vmem:[%s6235_s1 + $0x3b8] ss:$28 sps:$4 sm:$0xff]  }
  0x88   :  { %710 = vperm.xlu0 %4147, %v444_v19   ;;  %715 = vperm.xlu1 %4148, %v445_v21   ;;  %v5125_v41 = vpop.permute.xlu1 %530  ;;  %v4308_v21 = vld [vmem:[%s6235_s1 + $0x464] ss:$28 sps:$4 sm:$0xff]  }
  0x89   :  { %v5130_v43 = vpop.permute.xlu0 %615 }
  0x8a   :  { %2371 = vmatmul.mubr.bf16.gmra.mxu0 %v4240_v3  ;;  %2660 = vmatmul.mubr.bf16.gmra.mxu1 %v4241_v5  ;;  %v4293_v5 = vld [vmem:[%s6235_s1 + $0x3c0] ss:$28 sps:$4 sm:$0xff]  }
  0x8b   :  { %2378 = vmatprep.mubr.bf16.mxu0 %v4243_v6  ;;  %2667 = vmatprep.mubr.bf16.mxu1 %v4245_v7  ;;  %v4295_v6 = vld [vmem:[%s6235_s1 + $0x3f4] ss:$28 sps:$4 sm:$0xff]   ;;  %v4297_v7 = vld [vmem:[%s6235_s1 + $0x3fc] ss:$28 sps:$4 sm:$0xff]  }
  0x8c   :  { %630 = vperm.xlu0 %4147, %v428_v25   ;;  %635 = vperm.xlu1 %4148, %v429_v26   ;;  %v5144_v48 = vpop.permute.xlu1 %535  ;;  %v4312_v25 = vld [vmem:[%s6235_s1 + $0x460] ss:$28 sps:$4 sm:$0xff]   ;;  %v4313_v26 = vld [vmem:[%s6235_s1 + $0x468] ss:$28 sps:$4 sm:$0xff]  }
  0x8d   :  { %v5148_v49 = vpop.permute.xlu0 %600  ;;  %2875 = vmatpush2.bf16.msra.mxu0 %v4388_v1  ;;  %4144 = vmatpush2.bf16.msra.mxu1 %v4388_v1 }
  0x8e   :  { %4033 = vmatprep.subr.bf16.mxu1 %v5221_v9 }
  0x90   :  { %700 = vperm.xlu0 %4147, %v442_v27   ;;  %705 = vperm.xlu1 %4148, %v443_v29   ;;  %v5163_v54 = vpop.permute.xlu1 %605  ;;  %v4314_v27 = vld [vmem:[%s6235_s1 + $0x49c] ss:$28 sps:$4 sm:$0xff]  }
  0x91   :  { %v5172_v57 = vpop.permute.xlu0 %520 }
  0x92   :  { %2379 = vmatmul.mubr.bf16.gmra.mxu0 %v4247_v11  ;;  %2668 = vmatmul.mubr.bf16.gmra.mxu1 %v4248_v13  ;;  %v4299_v11 = vld [vmem:[%s6235_s1 + $0x3f0] ss:$28 sps:$4 sm:$0xff]   ;;  %v4300_v13 = vld [vmem:[%s6235_s1 + $0x3f8] ss:$28 sps:$4 sm:$0xff]  }
  0x93   :  { %2386 = vmatprep.mubr.bf16.mxu0 %v4249_v14  ;;  %2675 = vmatprep.mubr.bf16.mxu1 %v4251_v15  ;;  %v4301_v14 = vld [vmem:[%s6235_s1 + $0x42c] ss:$28 sps:$4 sm:$0xff]   ;;  %v4303_v15 = vld [vmem:[%s6235_s1 + $0x434] ss:$28 sps:$4 sm:$0xff]  }
  0x94   :  { %620 = vperm.xlu0 %4147, %v426_v33   ;;  %625 = vperm.xlu1 %4148, %v427_v34   ;;  %v5182_v60 = vpop.permute.xlu1 %525  ;;  %v4319_v33 = vld [vmem:[%s6235_s1 + $0x4a0] ss:$28 sps:$4 sm:$0xff]   ;;  %v4321_v34 = vld [vmem:[%s6235_s1 + $0x4d4] ss:$28 sps:$4 sm:$0xff]  }
  0x95   :  { %v5191_v63 = vpop.permute.xlu0 %590 }
  0x98   :  { %v5200_v3 = vpop.permute.xlu1 %595 }
  0x99   :  { %v5205_v4 = vpop.permute.xlu0 %510 }
  0x9a   :  { %2387 = vmatmul.mubr.bf16.gmra.mxu0 %v4253_v20  ;;  %2676 = vmatmul.mubr.bf16.gmra.mxu1 %v4254_v22  ;;  %v4306_v20 = vld [vmem:[%s6235_s1 + $0x430] ss:$28 sps:$4 sm:$0xff]  }
  0x9b   :  { %2394 = vmatprep.mubr.bf16.mxu0 %v4256_v23  ;;  %2683 = vmatprep.mubr.bf16.mxu1 %v4258_v24  ;;  %v4310_v22 = vld [vmem:[%s6235_s1 + $0x46c] ss:$28 sps:$4 sm:$0xff]  }
  0x9c   :  { %v5216_v8 = vpop.permute.xlu1 %515 }
  0x9d   :  { %v5223_v10 = vpop.permute.xlu0 %580 }
  0xa0   :  { %v5229_v12 = vpop.permute.xlu1 %585 }
  0xa1   :  { %v5240_v16 = vpop.permute.xlu0 %500 }
  0xa2   :  { %2395 = vmatmul.mubr.bf16.gmra.mxu0 %v4260_v28  ;;  %2684 = vmatmul.mubr.bf16.gmra.mxu1 %v4261_v30  ;;  %v4316_v28 = vld [vmem:[%s6235_s1 + $0x4a4] ss:$28 sps:$4 sm:$0xff]  }
  0xa3   :  { %2402 = vmatprep.mubr.bf16.mxu0 %v4262_v31  ;;  %2691 = vmatprep.mubr.bf16.mxu1 %v4264_v32  ;;  %v4318_v31 = vld [vmem:[%s6235_s1 + $0x498] ss:$28 sps:$4 sm:$0xff]  }
  0xa4   :  { %v5242_v17 = vpop.permute.xlu1 %505 }
  0xa5   :  { %v5247_v19 = vpop.permute.xlu0 %570 }
  0xa8   :  { %v5258_v23 = vpop.permute.xlu1 %575 }
  0xa9   :  { %v5260_v24 = vpop.permute.xlu0 %490 }
  0xaa   :  { %2403 = vmatmul.mubr.bf16.gmra.mxu0 %v4266_v36  ;;  %2692 = vmatmul.mubr.bf16.gmra.mxu1 %v4267_v37 }
  0xab   :  { %2410 = vmatprep.mubr.bf16.mxu0 %v4269_v38  ;;  %2699 = vmatprep.mubr.bf16.mxu1 %v4271_v40  ;;  %v4325_v38 = vld [vmem:[%s6235_s1 + $0x4d0] ss:$28 sps:$4 sm:$0xff]  }
  0xac   :  { %v5274_v29 = vpop.permute.xlu1 %495 }
  0xad   :  { %v5276_v30 = vpop.permute.xlu0 %560 }
  0xb0   :  { %v5281_v32 = vpop.permute.xlu1 %565 }
  0xb1   :  { %v5292_v36 = vpop.permute.xlu0 %480 }
  0xb2   :  { %2411 = vmatmul.mubr.bf16.gmra.mxu0 %v4273_v42  ;;  %2700 = vmatmul.mubr.bf16.gmra.mxu1 %v4274_v44  ;;  %v4326_v42 = vld [vmem:[%s6235_s1 + $0x4d8] ss:$28 sps:$4 sm:$0xff]   ;;  %v4327_v44 = vld [vmem:[%s6235_s1 + $0x50c] ss:$28 sps:$4 sm:$0xff]  }
  0xb3   :  { %2418 = vmatprep.mubr.bf16.mxu0 %v4275_v45  ;;  %2707 = vmatprep.mubr.bf16.mxu1 %v4277_v47  ;;  %v4329_v45 = vld [vmem:[%s6235_s1 + $0x514] ss:$28 sps:$4 sm:$0xff]  }
  0xb4   :  { %v5294_v37 = vpop.permute.xlu1 %485 }
  0xb5   :  { %v5299_v40 = vpop.permute.xlu0 %550 }
  0xb8   :  { %v5310_v46 = vpop.permute.xlu1 %555 }
  0xb9   :  { %v471_v47 = vpop.permute.xlu0 %470 }
  0xba   :  { %2419 = vmatmul.mubr.bf16.gmra.mxu0 %v4279_v51  ;;  %2708 = vmatmul.mubr.bf16.gmra.mxu1 %v4280_v52  ;;  %v4332_v51 = vld [vmem:[%s6235_s1 + $0x510] ss:$28 sps:$4 sm:$0xff]   ;;  %v4334_v52 = vld [vmem:[%s6235_s1 + $0x544] ss:$28 sps:$4 sm:$0xff]  }
  0xbb   :  { %2426 = vmatprep.mubr.bf16.mxu0 %v4282_v53  ;;  %2715 = vmatprep.mubr.bf16.mxu1 %v4284_v56 }
  0xbc   :  { %v476_v53 = vpop.permute.xlu1 %475 }
  0xc1   :  { %v5324_v56 = vpop.permute.xlu0 %540  ;;  %v5326_v58 = vpop.permute.xlu1 %545 }
  0xc2   :  { %2427 = vmatmul.mubr.bf16.gmra.mxu0 %v4286_v59  ;;  %2716 = vmatmul.mubr.bf16.gmra.mxu1 %v4287_v61  ;;  %v4338_v59 = vld [vmem:[%s6235_s1 + $0x540] ss:$28 sps:$4 sm:$0xff]   ;;  %v4339_v61 = vld [vmem:[%s6235_s1 + $0x548] ss:$28 sps:$4 sm:$0xff]  }
  0xc3   :  { %2434 = vmatprep.mubr.bf16.mxu0 %v4288_v62  ;;  %2723 = vmatprep.mubr.bf16.mxu1 %v4290_v2  ;;  %v4340_v62 = vld [vmem:[%s6235_s1 + $0x57c] ss:$28 sps:$4 sm:$0xff]   ;;  %v4342_v2 = vld [vmem:[%s6235_s1 + $0x584] ss:$28 sps:$4 sm:$0xff]  }
  0xc9   :  { %v461_v1 = vpop.permute.xlu0 %460 }
  0xca   :  { %2435 = vmatmul.mubr.bf16.gmra.mxu0 %v4292_v0  ;;  %2724 = vmatmul.mubr.bf16.gmra.mxu1 %v4293_v5 }
  0xcb   :  { %2442 = vmatprep.mubr.bf16.mxu0 %v4295_v6  ;;  %2731 = vmatprep.mubr.bf16.mxu1 %v4297_v7 }
  0xd2   :  { %2443 = vmatmul.mubr.bf16.gmra.mxu0 %v4299_v11  ;;  %2732 = vmatmul.mubr.bf16.gmra.mxu1 %v4300_v13  ;;  %v466_v11 = vpop.permute.xlu1 %465 }
  0xd3   :  { %2450 = vmatprep.mubr.bf16.mxu0 %v4301_v14  ;;  %2739 = vmatprep.mubr.bf16.mxu1 %v4303_v15 }
  0xda   :  { %2451 = vmatmul.mubr.bf16.gmra.mxu0 %v4305_v18  ;;  %2740 = vmatmul.mubr.bf16.gmra.mxu1 %v4306_v20  ;;  %v4344_v18 = vld [vmem:[%s6235_s1 + $0x578] ss:$28 sps:$4 sm:$0xff]  }
  0xdb   :  { %2458 = vmatprep.mubr.bf16.mxu0 %v4308_v21  ;;  %2747 = vmatprep.mubr.bf16.mxu1 %v4310_v22  ;;  %v4345_v22 = vld [vmem:[%s6235_s1 + $0x580] ss:$28 sps:$4 sm:$0xff]  }
  0xe2   :  { %2459 = vmatmul.mubr.bf16.gmra.mxu0 %v4312_v25  ;;  %2748 = vmatmul.mubr.bf16.gmra.mxu1 %v4313_v26  ;;  %v4347_v25 = vld [vmem:[%s6235_s1 + $0x5b4] ss:$28 sps:$4 sm:$0xff]  }
  0xe3   :  { %2466 = vmatprep.mubr.bf16.mxu0 %v4314_v27  ;;  %2755 = vmatprep.mubr.bf16.mxu1 %v4316_v28  ;;  %v4349_v27 = vld [vmem:[%s6235_s1 + $0x5bc] ss:$28 sps:$4 sm:$0xff]  }
  0xea   :  { %2467 = vmatmul.mubr.bf16.gmra.mxu0 %v4318_v31  ;;  %2756 = vmatmul.mubr.bf16.gmra.mxu1 %v4319_v33 }
  0xeb   :  { %2474 = vmatprep.mubr.bf16.mxu0 %v4321_v34  ;;  %2763 = vmatprep.mubr.bf16.mxu1 %v4323_v35 }
  0xf2   :  { %2475 = vmatmul.mubr.bf16.gmra.mxu0 %v4325_v38  ;;  %2764 = vmatmul.mubr.bf16.gmra.mxu1 %v4326_v42 }
  0xf3   :  { %2482 = vmatprep.mubr.bf16.mxu0 %v4327_v44  ;;  %2771 = vmatprep.mubr.bf16.mxu1 %v4329_v45 }
  0xfa   :  { %2483 = vmatmul.mubr.bf16.gmra.mxu0 %v4331_v50  ;;  %2772 = vmatmul.mubr.bf16.gmra.mxu1 %v4332_v51  ;;  %v4351_v50 = vld [vmem:[%s6235_s1 + $0x5b0] ss:$28 sps:$4 sm:$0xff]  }
  0xfb   :  { %2490 = vmatprep.mubr.bf16.mxu0 %v4334_v52  ;;  %2779 = vmatprep.mubr.bf16.mxu1 %v4336_v55  ;;  %v4352_v55 = vld [vmem:[%s6235_s1 + $0x5b8] ss:$28 sps:$4 sm:$0xff]  }
 0x102   :  { %v2300_v0 = vpop.f32.mrf.mxu0  ;;  %2491 = vmatmul.mubr.bf16.gmra.mxu0 %v4338_v59  ;;  %v2589_v6 = vpop.f32.mrf.mxu1  ;;  %2780 = vmatmul.mubr.bf16.gmra.mxu1 %v4339_v61  ;;  %v4355_v61 = vld [vmem:[%s6235_s1 + $0x5f4] ss:$28 sps:$4 sm:$0xff]  }
 0x103   :  { %v2301_v5 = vadd.f32 %v2300_v0, %v461_v1  ;;  %2498 = vmatprep.mubr.bf16.mxu0 %v4340_v62  ;;  %2787 = vmatprep.mubr.bf16.mxu1 %v4342_v2 }
 0x104   :  { %v2302_v7 = vpop.f32.mrf.mxu0  ;;  %v2591_v14 = vpop.f32.mrf.mxu1 }
 0x105   :  { %v5340_v13 = vadd.f32 %v2589_v6, %v2301_v5  ;;  %v4357_v14 = vld [vmem:[%s6235_s1 + $0x5e8] ss:$28 sps:$4 sm:$0xff]  }
 0x106   :  { %v2303_v15 = vpop.f32.mrf.mxu0  ;;  %v2592_v21 = vpop.f32.mrf.mxu1 }
 0x107   :  { %v2304_v20 = vadd.f32 %v2303_v15, %v466_v11 }
 0x108   :  { %v2305_v26 = vpop.f32.mrf.mxu0  ;;  %v2594_v31 = vpop.f32.mrf.mxu1 }
 0x109   :  { %v5354_v28 = vadd.f32 %v2592_v21, %v2304_v20  ;;  %v4362_v20 = vld [vmem:[%s6235_s1 + $0x624] ss:$28 sps:$4 sm:$0xff]  }
 0x10a   :  { %v2308_v33 = vpop.f32.mrf.mxu0  ;;  %2499 = vmatmul.mubr.bf16.gmra.mxu0 %v4344_v18  ;;  %v2597_v35 = vpop.f32.mrf.mxu1  ;;  %2788 = vmatmul.mubr.bf16.gmra.mxu1 %v4345_v22  ;;  %v4365_v22 = vld [vmem:[%s6235_s1 + $0x62c] ss:$28 sps:$4 sm:$0xff]  }
 0x10b   :  { %v2309_v34 = vadd.f32 %v2308_v33, %v471_v47  ;;  %2506 = vmatprep.mubr.bf16.mxu0 %v4347_v25  ;;  %2795 = vmatprep.mubr.bf16.mxu1 %v4349_v27  ;;  %v4353_v47 = vld [vmem:[%s6235_s1 + $0x5ec] ss:$28 sps:$4 sm:$0xff]  }
 0x10c   :  { %v2310_v38 = vpop.f32.mrf.mxu0  ;;  %v2599_v44 = vpop.f32.mrf.mxu1 }
 0x10d   :  { %v5356_v42 = vadd.f32 %v2597_v35, %v2309_v34  ;;  %v4360_v44 = vld [vmem:[%s6235_s1 + $0x620] ss:$28 sps:$4 sm:$0xff]  }
 0x10e   :  { %v2311_v45 = vpop.f32.mrf.mxu0  ;;  %v2600_v52 = vpop.f32.mrf.mxu1 }
 0x10f   :  { %v2312_v51 = vadd.f32 %v2311_v45, %v476_v53 }
 0x110   :  { %v2313_v59 = vpop.f32.mrf.mxu0  ;;  %v2602_v1 = vpop.f32.mrf.mxu1 }
 0x111   :  { %v5370_v62 = vadd.f32 %v2600_v52, %v2312_v51  ;;  %v4368_v51 = vld [vmem:[%s6235_s1 + $0x65c] ss:$28 sps:$4 sm:$0xff]  }
 0x112   :  { %v2316_v2 = vpop.f32.mrf.mxu0  ;;  %2507 = vmatmul.mubr.bf16.gmra.mxu0 %v4351_v50  ;;  %v2605_v0 = vpop.f32.mrf.mxu1  ;;  %2796 = vmatmul.mubr.bf16.gmra.mxu1 %v4352_v55  ;;  %v4371_v55 = vld [vmem:[%s6235_s1 + $0x664] ss:$28 sps:$4 sm:$0xff]  }
 0x113   :  { %v2317_v53 = vadd.f32 %v2316_v2, %v5292_v36  ;;  %2514 = vmatprep.mubr.bf16.mxu0 %v4353_v47  ;;  %2803 = vmatprep.mubr.bf16.mxu1 %v4355_v61  ;;  %v4358_v36 = vld [vmem:[%s6235_s1 + $0x5f0] ss:$28 sps:$4 sm:$0xff]  }
 0x114   :  { %v2318_v5 = vpop.f32.mrf.mxu0  ;;  %v2607_v7 = vpop.f32.mrf.mxu1 }
 0x115   :  { %v5373_v6 = vadd.f32 %v2605_v0, %v2317_v53  ;;  %v4366_v7 = vld [vmem:[%s6235_s1 + $0x658] ss:$28 sps:$4 sm:$0xff]  }
 0x116   :  { %v2319_v11 = vpop.f32.mrf.mxu0  ;;  %v2608_v18 = vpop.f32.mrf.mxu1 }
 0x117   :  { %v2320_v15 = vadd.f32 %v2319_v11, %v5294_v37  ;;  %v5414_v11 = vpop.permute.xlu0 %770 }
 0x118   :  { %v2321_v21 = vpop.f32.mrf.mxu0  ;;  %v2610_v26 = vpop.f32.mrf.mxu1 }
 0x119   :  { %v5388_v25 = vadd.f32 %v2608_v18, %v2320_v15  ;;  %v4375_v18 = vld [vmem:[%s6235_s1 + $0x694] ss:$28 sps:$4 sm:$0xff]  }
 0x11a   :  { %v2324_v27 = vpop.f32.mrf.mxu0  ;;  %2515 = vmatmul.mubr.bf16.gmra.mxu0 %v4357_v14  ;;  %v2613_v31 = vpop.f32.mrf.mxu1  ;;  %2804 = vmatmul.mubr.bf16.gmra.mxu1 %v4358_v36 }
 0x11b   :  { %v2325_v37 = vadd.f32 %v2324_v27, %v5260_v24  ;;  %2522 = vmatprep.mubr.bf16.mxu0 %v4362_v20  ;;  %2811 = vmatprep.mubr.bf16.mxu1 %v4365_v22  ;;  %v4363_v24 = vld [vmem:[%s6235_s1 + $0x628] ss:$28 sps:$4 sm:$0xff]   ;;  %v4378_v20 = vld [vmem:[%s6235_s1 + $0x69c] ss:$28 sps:$4 sm:$0xff]  }
 0x11c   :  { %v2326_v33 = vpop.f32.mrf.mxu0  ;;  %v2615_v35 = vpop.f32.mrf.mxu1 }
 0x11d   :  { %v5391_v34 = vadd.f32 %v2613_v31, %v2325_v37  ;;  %v5431_v33 = vpop.permute.xlu0 %690 }
 0x11e   :  { %v2327_v38 = vpop.f32.mrf.mxu0  ;;  %v2616_v50 = vpop.f32.mrf.mxu1 }
 0x11f   :  { %v2328_v45 = vadd.f32 %v2327_v38, %v5274_v29 }
 0x120   :  { %v2329_v52 = vpop.f32.mrf.mxu0  ;;  %v2618_v59 = vpop.f32.mrf.mxu1 }
 0x121   :  { %v5406_v47 = vadd.f32 %v2616_v50, %v2328_v45  ;;  %v4373_v45 = vld [vmem:[%s6235_s1 + $0x690] ss:$28 sps:$4 sm:$0xff]  }
 0x122   :  { %v2332_v61 = vpop.f32.mrf.mxu0  ;;  %2523 = vmatmul.mubr.bf16.gmra.mxu0 %v4360_v44  ;;  %v2621_v1 = vpop.f32.mrf.mxu1  ;;  %2812 = vmatmul.mubr.bf16.gmra.mxu1 %v4363_v24 }
 0x123   :  { %v2333_v29 = vadd.f32 %v2332_v61, %v5240_v16  ;;  %2530 = vmatprep.mubr.bf16.mxu0 %v4368_v51  ;;  %2819 = vmatprep.mubr.bf16.mxu1 %v4371_v55  ;;  %v4369_v16 = vld [vmem:[%s6235_s1 + $0x660] ss:$28 sps:$4 sm:$0xff]   ;;  %v4383_v51 = vld [vmem:[%s6235_s1 + $0x6cc] ss:$28 sps:$4 sm:$0xff]   ;;  %v4386_v55 = vld [vmem:[%s6235_s1 + $0x6d4] ss:$28 sps:$4 sm:$0xff]  }
 0x124   :  { %v2334_v2 = vpop.f32.mrf.mxu0  ;;  %v2623_v0 = vpop.f32.mrf.mxu1 }
 0x125   :  { %v5409_v53 = vadd.f32 %v2621_v1, %v2333_v29  ;;  %v5452_v1 = vpop.permute.xlu0 %760 }
 0x126   :  { %v2335_v5 = vpop.f32.mrf.mxu0  ;;  %v2624_v15 = vpop.f32.mrf.mxu1 }
 0x127   :  { %v2336_v14 = vadd.f32 %v2335_v5, %v5242_v17  ;;  %v5428_v17 = vpop.permute.xlu1 %775 }
 0x128   :  { %v2337_v36 = vpop.f32.mrf.mxu0  ;;  %v2626_v22 = vpop.f32.mrf.mxu1 }
 0x129   :  { %v5426_v21 = vadd.f32 %v2624_v15, %v2336_v14  ;;  %v4391_v22 = vld [vmem:[%s6235_s1 + $0x14] ss:$28 sps:$4 sm:$0xff]  }
 0x12a   :  { %v2340_v26 = vpop.f32.mrf.mxu0  ;;  %2531 = vmatmul.mubr.bf16.gmra.mxu0 %v4366_v7  ;;  %v2629_v37 = vpop.f32.mrf.mxu1  ;;  %2820 = vmatmul.mubr.bf16.gmra.mxu1 %v4369_v16  ;;  %v4381_v16 = vld [vmem:[%s6235_s1 + $0x6c8] ss:$28 sps:$4 sm:$0xff]  }
 0x12b   :  { %v2341_v27 = vadd.f32 %v2340_v26, %v5205_v4  ;;  %2538 = vmatprep.mubr.bf16.mxu0 %v4375_v18  ;;  %2827 = vmatprep.mubr.bf16.mxu1 %v4378_v20  ;;  %v4376_v4 = vld [vmem:[%s6235_s1 + $0x698] ss:$28 sps:$4 sm:$0xff]   ;;  %v5448_v59 = vpop.permute.xlu1 %695 }
 0x12c   :  { %v2342_v31 = vpop.f32.mrf.mxu0  ;;  %v2631_v38 = vpop.f32.mrf.mxu1 }
 0x12d   :  { %v5433_v35 = vadd.f32 %v2629_v37, %v2341_v27  ;;  %v4394_v27 = vld [vmem:[%s6235_s1 + $0x5fc] ss:$28 sps:$4 sm:$0xff]   ;;  %v5472_v37 = vpop.permute.xlu0 %680 }
 0x12e   :  { %v2343_v44 = vpop.f32.mrf.mxu0  ;;  %v2632_v24 = vpop.f32.mrf.mxu1 }
 0x12f   :  { %v2344_v50 = vadd.f32 %v2343_v44, %v5216_v8  ;;  %v5460_v18 = vpop.permute.xlu1 %765 }
 0x130   :  { %v2345_v52 = vpop.f32.mrf.mxu0  ;;  %v2634_v29 = vpop.f32.mrf.mxu1 }
 0x131   :  { %v5450_v61 = vadd.f32 %v2632_v24, %v2344_v50  ;;  %v5484_v29 = vpop.permute.xlu0 %750 }
 0x132   :  { %v2348_v8 = vpop.f32.mrf.mxu0  ;;  %2539 = vmatmul.mubr.bf16.gmra.mxu0 %v4373_v45  ;;  %v2637_v0 = vpop.f32.mrf.mxu1  ;;  %2828 = vmatmul.mubr.bf16.gmra.mxu1 %v4376_v4 }
 0x133   :  { %v2349_v2 = vadd.f32 %v2348_v8, %v5172_v57  ;;  %2546 = vmatprep.mubr.bf16.mxu0 %v4383_v51  ;;  %2835 = vmatprep.mubr.bf16.mxu1 %v4386_v55  ;;  %v4384_v57 = vld [vmem:[%s6235_s1 + $0x6d0] ss:$28 sps:$4 sm:$0xff]   ;;  %v5477_v24 = vpop.permute.xlu1 %685 }
 0x134   :  { %v2350_v5 = vpop.f32.mrf.mxu0  ;;  %v2639_v14 = vpop.f32.mrf.mxu1  ;;  %v4389_v55 = vld [vmem:[%s6235_s1 + $0x10] ss:$28 sps:$4 sm:$0xff]  }
 0x135   :  { %v5455_v7 = vadd.f32 %v2637_v0, %v2349_v2  ;;  %v4392_v2 = vld [vmem:[%s6235_s1 + $0x5f8] ss:$28 sps:$4 sm:$0xff]   ;;  %v4397_v0 = vld [vmem:[%s6235_s1 + $0x4c] ss:$28 sps:$4 sm:$0xff]  }
 0x136   :  { %v2351_v15 = vpop.f32.mrf.mxu0  ;;  %v2640_v20 = vpop.f32.mrf.mxu1  ;;  %v4400_v14 = vld [vmem:[%s6235_s1 + $0x634] ss:$28 sps:$4 sm:$0xff]  }
 0x137   :  { %v2352_v36 = vadd.f32 %v2351_v15, %v5182_v60 }
 0x138   :  { %v2353_v26 = vpop.f32.mrf.mxu0  ;;  %v2642_v38 = vpop.f32.mrf.mxu1 }
 0x139   :  { %v5474_v31 = vadd.f32 %v2640_v20, %v2352_v36  ;;  %v5501_v20 = vpop.permute.xlu1 %755 }
 0x13a   :  { %v2356_v60 = vpop.f32.mrf.mxu0  ;;  %2547 = vmatmul.mubr.bf16.gmra.mxu0 %v4381_v16  ;;  %v2645_v45 = vpop.f32.mrf.mxu1  ;;  %2836 = vmatmul.mubr.bf16.gmra.mxu1 %v4384_v57 }
 0x13b   :  { %v2357_v44 = vadd.f32 %v2356_v60, %v5125_v41  ;;  %2876 = vmatprep.mubr.bf16.mxu0 %v4391_v22  ;;  %3092 = vmatprep.mubr.bf16.mxu1 %v4394_v27  ;;  %v5505_v27 = vpop.permute.xlu0 %670 }
 0x13c   :  { %v2358_v50 = vpop.f32.mrf.mxu0  ;;  %v2647_v51 = vpop.f32.mrf.mxu1 }
 0x13d   :  { %v5479_v4 = vadd.f32 %v2645_v45, %v2357_v44  ;;  %v4409_v44 = vld [vmem:[%s6234_s0 + $0x1a8] sm:$0xff]  }
 0x13e   :  { %v2359_v52 = vpop.f32.mrf.mxu0  ;;  %v2648_v41 = vpop.f32.mrf.mxu1 }
 0x13f   :  { %v2360_v8 = vadd.f32 %v2359_v52, %v5144_v48  ;;  %v4402_v48 = vld [vmem:[%s6234_s0 + $0x1b0] sm:$0xff]   ;;  %v4405_v52 = vld [vmem:[%s6235_s1 + $0x84] ss:$28 sps:$4 sm:$0xff]  }
 0x140   :  { %v2361_v5 = vpop.f32.mrf.mxu0  ;;  %v2650_v16 = vpop.f32.mrf.mxu1 }
 0x141   :  { %v5496_v15 = vadd.f32 %v2648_v41, %v2360_v8  ;;  %v4408_v8 = vld [vmem:[%s6235_s1 + $0x66c] ss:$28 sps:$4 sm:$0xff]   ;;  %v5525_v41 = vpop.permute.xlu1 %675 }
 0x142   :  { %v2364_v36 = vpop.f32.mrf.mxu0  ;;  %2877 = vmatmul.mubr.bf16.vlgmr.msra.gmra.mxu0 %v4389_v55  ;;  %v2653_v22 = vpop.f32.mrf.mxu1  ;;  %3093 = vmatmul.mubr.bf16.vlgmr.msra.gmra.mxu1 %v4392_v2 }
 0x143   :  { %v2365_v57 = vadd.f32 %v2364_v36, %v5324_v56  ;;  %2884 = vmatprep.mubr.bf16.mxu0 %v4397_v0  ;;  %3100 = vmatprep.mubr.bf16.mxu1 %v4400_v14  ;;  %v4395_v56 = vld [vmem:[%s6235_s1 + $0x48] ss:$28 sps:$4 sm:$0xff]   ;;  %v5532_v14 = vpop.permute.xlu0 %740 }
 0x144   :  { %v2366_v26 = vpop.f32.mrf.mxu0  ;;  %4034 = vmatpush3.bf16.msra.mxu1 %v5221_v9  ;;  %v2655_v60 = vpop.f32.mrf.mxu1  ;;  %v4398_v9 = vld [vmem:[%s6235_s1 + $0x630] ss:$28 sps:$4 sm:$0xff]   ;;  %v4410_v0 = vld [vmem:[%s6234_s0 + $0x1a0] sm:$0xff]  }
 0x145   :  { %v5507_v38 = vadd.f32 %v2653_v22, %v2365_v57  ;;  %4035 = vmatprep.subr.bf16.mxu1 %v4402_v48  ;;  %v4417_v26 = vld [vmem:[%s6234_s0 + $0x198] sm:$0xff]  }
 0x146   :  { %v2367_v45 = vpop.f32.mrf.mxu0  ;;  %v2656_v51 = vpop.f32.mrf.mxu1 }
 0x147   :  { %6242 = vst [vmem:[#allocation2_spill] sm:$0xff] %v5507_v38  ;;  %v2368_v50 = vadd.f32 %v2367_v45, %v5326_v58  ;;  %v4403_v45 = vld [vmem:[%s6235_s1 + $0x80] ss:$28 sps:$4 sm:$0xff]   ;;  %v4447_v38 = vld [vmem:[%s6235_s1 + $0x208] ss:$28 sps:$4 sm:$0xff]  }
 0x148   :  { %v2369_v55 = vpop.f32.mrf.mxu0  ;;  %4036 = vmatpush3.bf16.msra.mxu1 %v4402_v48  ;;  %v2658_v58 = vpop.f32.mrf.mxu1 }
 0x149   :  { %v5527_v2 = vadd.f32 %v2656_v51, %v2368_v50  ;;  %4037 = vmatprep.subr.bf16.mxu1 %v4409_v44  ;;  %v4413_v51 = vld [vmem:[%s6235_s1 + $0xbc] ss:$28 sps:$4 sm:$0xff]   ;;  %v5555_v55 = vpop.permute.xlu0 %660  ;;  %v4418_v58 = vld [vmem:[%s6234_s0 + $0x190] sm:$0xff]  }
 0x14a   :  { %v2372_v5 = vpop.f32.mrf.mxu0  ;;  %2885 = vmatmul.mubr.bf16.gmra.mxu0 %v4395_v56  ;;  %v2661_v48 = vpop.f32.mrf.mxu1  ;;  %3101 = vmatmul.mubr.bf16.gmra.mxu1 %v4398_v9 }
 0x14b   :  { %6243 = vst [vmem:[#allocation3_spill] sm:$0xff] %v5527_v2  ;;  %v2373_v16 = vadd.f32 %v2372_v5, %v5299_v40  ;;  %2892 = vmatprep.mubr.bf16.mxu0 %v4405_v52  ;;  %3108 = vmatprep.mubr.bf16.mxu1 %v4408_v8  ;;  %v5543_v40 = vpop.permute.xlu1 %745  ;;  %v4416_v52 = vld [vmem:[%s6235_s1 + $0x6a4] ss:$28 sps:$4 sm:$0xff]  }
 0x14c   :  { %v2374_v36 = vpop.f32.mrf.mxu0  ;;  %4038 = vmatpush3.bf16.msra.mxu1 %v4409_v44  ;;  %v2663_v22 = vpop.f32.mrf.mxu1  ;;  %v4406_v44 = vld [vmem:[%s6235_s1 + $0x668] ss:$28 sps:$4 sm:$0xff]  }
 0x14d   :  { %v5535_v57 = vadd.f32 %v2661_v48, %v2373_v16  ;;  %4039 = vmatprep.subr.bf16.mxu1 %v4410_v0 }
 0x14e   :  { %v2375_v60 = vpop.f32.mrf.mxu0  ;;  %v2664_v50 = vpop.f32.mrf.mxu1 }
 0x14f   :  { %6244 = vst [vmem:[#allocation4_spill] sm:$0xff] %v5535_v57  ;;  %v2376_v56 = vadd.f32 %v2375_v60, %v5310_v46  ;;  %v5563_v36 = vpop.permute.xlu1 %665 }
 0x150   :  { %v2377_v9 = vpop.f32.mrf.mxu0  ;;  %4040 = vmatpush3.bf16.msra.mxu1 %v4410_v0  ;;  %v2666_v46 = vpop.f32.mrf.mxu1 }
 0x151   :  { %v5557_v8 = vadd.f32 %v2664_v50, %v2376_v56  ;;  %4041 = vmatprep.subr.bf16.mxu1 %v4417_v26  ;;  %v4425_v56 = vld [vmem:[%s6234_s0 + $0x188] sm:$0xff]   ;;  %v4421_v9 = vld [vmem:[%s6235_s1 + $0xf4] ss:$28 sps:$4 sm:$0xff]   ;;  %v4424_v46 = vld [vmem:[%s6235_s1 + $0x6dc] ss:$28 sps:$4 sm:$0xff]  }
 0x152   :  { %v2380_v5 = vpop.f32.mrf.mxu0  ;;  %2893 = vmatmul.mubr.bf16.gmra.mxu0 %v4403_v45  ;;  %v2669_v48 = vpop.f32.mrf.mxu1  ;;  %3109 = vmatmul.mubr.bf16.gmra.mxu1 %v4406_v44 }
 0x153   :  { %6245 = vst [vmem:[#allocation5_spill] sm:$0xff] %v5557_v8  ;;  %v2381_v16 = vadd.f32 %v2380_v5, %v5276_v30  ;;  %2900 = vmatprep.mubr.bf16.mxu0 %v4413_v51  ;;  %3116 = vmatprep.mubr.bf16.mxu1 %v4416_v52  ;;  %v4411_v30 = vld [vmem:[%s6235_s1 + $0xb8] ss:$28 sps:$4 sm:$0xff]   ;;  %v5573_v45 = vpop.permute.xlu0 %730  ;;  %v4414_v51 = vld [vmem:[%s6235_s1 + $0x6a0] ss:$28 sps:$4 sm:$0xff]  }
 0x154   :  { %v2382_v0 = vpop.f32.mrf.mxu0  ;;  %4042 = vmatpush3.bf16.msra.mxu1 %v4417_v26  ;;  %v2671_v60 = vpop.f32.mrf.mxu1 }
 0x155   :  { %v5565_v22 = vadd.f32 %v2669_v48, %v2381_v16  ;;  %4043 = vmatprep.subr.bf16.mxu1 %v4418_v58  ;;  %v5590_v0 = vpop.permute.xlu1 %735 }
 0x156   :  { %v2383_v50 = vpop.f32.mrf.mxu0  ;;  %v2672_v26 = vpop.f32.mrf.mxu1 }
 0x157   :  { %6246 = vst [vmem:[#allocation6_spill] sm:$0xff] %v5565_v22  ;;  %v2384_v44 = vadd.f32 %v2383_v50, %v5281_v32  ;;  %v4426_v32 = vld [vmem:[%s6234_s0 + $0x180] sm:$0xff]  }
 0x158   :  { %v2385_v52 = vpop.f32.mrf.mxu0  ;;  %4044 = vmatpush3.bf16.msra.mxu1 %v4418_v58  ;;  %v2674_v16 = vpop.f32.mrf.mxu1 }
 0x159   :  { %v5585_v5 = vadd.f32 %v2672_v26, %v2384_v44  ;;  %4045 = vmatprep.subr.bf16.mxu1 %v4425_v56  ;;  %v5593_v44 = vpop.permute.xlu0 %650 }
 0x15a   :  { %v2388_v48 = vpop.f32.mrf.mxu0  ;;  %2901 = vmatmul.mubr.bf16.gmra.mxu0 %v4411_v30  ;;  %v2677_v50 = vpop.f32.mrf.mxu1  ;;  %3117 = vmatmul.mubr.bf16.gmra.mxu1 %v4414_v51  ;;  %v4419_v30 = vld [vmem:[%s6235_s1 + $0xf0] ss:$28 sps:$4 sm:$0xff]   ;;  %v4422_v51 = vld [vmem:[%s6235_s1 + $0x6d8] ss:$28 sps:$4 sm:$0xff]  }
 0x15b   :  { %6247 = vst [vmem:[#allocation7_spill] sm:$0xff] %v5585_v5  ;;  %v2389_v60 = vadd.f32 %v2388_v48, %v5247_v19  ;;  %2908 = vmatprep.mubr.bf16.mxu0 %v4421_v9  ;;  %3124 = vmatprep.mubr.bf16.mxu1 %v4424_v46  ;;  %v4430_v46 = vld [vmem:[%s6235_s1 + $0x18] ss:$28 sps:$4 sm:$0xff]   ;;  %v5610_v48 = vpop.permute.xlu1 %655 }
 0x15c   :  { %v2390_v58 = vpop.f32.mrf.mxu0  ;;  %4046 = vmatpush3.bf16.msra.mxu1 %v4425_v56  ;;  %v2679_v52 = vpop.f32.mrf.mxu1  ;;  %v4429_v56 = vld [vmem:[%s6235_s1 + $0x12c] ss:$28 sps:$4 sm:$0xff]  }
 0x15d   :  { %v5595_v26 = vadd.f32 %v2677_v50, %v2389_v60  ;;  %4047 = vmatprep.subr.bf16.mxu1 %v4426_v32  ;;  %v5614_v58 = vpop.permute.xlu0 %720 }
 0x15e   :  { %v2391_v16 = vpop.f32.mrf.mxu0  ;;  %v2680_v19 = vpop.f32.mrf.mxu1 }
 0x15f   :  { %6248 = vst [vmem:[#allocation8_spill] sm:$0xff] %v5595_v26  ;;  %v2392_v5 = vadd.f32 %v2391_v16, %v5258_v23 }
 0x160   :  { %v2393_v9 = vpop.f32.mrf.mxu0  ;;  %4048 = vmatpush3.bf16.msra.mxu1 %v4426_v32  ;;  %v2682_v23 = vpop.f32.mrf.mxu1  ;;  %v3519_v32 = vld [vmem:[%s6237_s4] sm:$0xf] }
 0x161   :  { %v5612_v60 = vadd.f32 %v2680_v19, %v2392_v5  ;;  %3522 = vperm.xlu0 %4147, %v3519_v32   ;;  %v5625_v23 = vpop.permute.xlu1 %725 }
 0x162   :  { %v2396_v50 = vpop.f32.mrf.mxu0  ;;  %2909 = vmatmul.mubr.bf16.gmra.mxu0 %v4419_v30  ;;  %v2685_v16 = vpop.f32.mrf.mxu1  ;;  %3125 = vmatmul.mubr.bf16.gmra.mxu1 %v4422_v51  ;;  %v4427_v30 = vld [vmem:[%s6235_s1 + $0x128] ss:$28 sps:$4 sm:$0xff]  }
 0x163   :  { %6249 = vst [vmem:[#allocation9_spill] sm:$0xff] %v5612_v60  ;;  %v2397_v52 = vadd.f32 %v2396_v50, %v5223_v10  ;;  %2916 = vmatprep.mubr.bf16.mxu0 %v4429_v56  ;;  %4049 = vmatprep.mubr.bf16.mxu1 %v4430_v46  ;;  %v4431_v56 = vld [vmem:[%s6235_s1 + $0x50] ss:$28 sps:$4 sm:$0xff]   ;;  %v4434_v46 = vld [vmem:[%s6235_s1 + $0x164] ss:$28 sps:$4 sm:$0xff]  }
 0x164   :  { %v2398_v9 = vpop.f32.mrf.mxu0  ;;  %v2687_v5 = vpop.f32.mrf.mxu1 }
 0x165   :  { %v5620_v26 = vadd.f32 %v2685_v16, %v2397_v52  ;;  %v4435_v52 = vld [vmem:[%s6235_s1 + $0x88] ss:$28 sps:$4 sm:$0xff]   ;;  %v5637_v16 = vpop.permute.xlu0 %640  ;;  %v5642_v60 = vpop.permute.xlu1 %645 }
 0x166   :  { %v2399_v19 = vpop.f32.mrf.mxu0  ;;  %v2688_v51 = vpop.f32.mrf.mxu1 }
 0x167   :  { %6250 = vst [vmem:[#allocation10_spill] sm:$0xff] %v5620_v26  ;;  %v2400_v10 = vadd.f32 %v2399_v19, %v5229_v12 }
 0x168   :  { %v2401_v50 = vpop.f32.mrf.mxu0  ;;  %v2690_v32 = vpop.f32.mrf.mxu1 }
 0x169   :  { %v5639_v9 = vadd.f32 %v2688_v51, %v2400_v10  ;;  %v4432_v10 = vld [vmem:[%s6235_s1 + $0x160] ss:$28 sps:$4 sm:$0xff]   ;;  %v5649_v51 = vpop.permute.xlu0 %710 }
 0x16a   :  { %v2404_v12 = vpop.f32.mrf.mxu0  ;;  %2917 = vmatmul.mubr.bf16.gmra.mxu0 %v4427_v30  ;;  %v2693_v19 = vpop.f32.mrf.mxu1  ;;  %4050 = vmatmul.mubr.bf16.vlgmr.msra.gmra.mxu1 %v4431_v56  ;;  %v4439_v56 = vld [vmem:[%s6235_s1 + $0x19c] ss:$28 sps:$4 sm:$0xff]  }
 0x16b   :  { %6251 = vst [vmem:[#allocation11_spill] sm:$0xff] %v5639_v9  ;;  %v2405_v5 = vadd.f32 %v2404_v12, %v5191_v63  ;;  %2924 = vmatprep.mubr.bf16.mxu0 %v4434_v46  ;;  %4053 = vmatprep.mubr.bf16.mxu1 %v4435_v52 }
 0x16c   :  { %v2406_v26 = vpop.f32.mrf.mxu0  ;;  %v2695_v22 = vpop.f32.mrf.mxu1 }
 0x16d   :  { %v5644_v50 = vadd.f32 %v2693_v19, %v2405_v5  ;;  %v4436_v26 = vld [vmem:[%s6235_s1 + $0xc0] ss:$28 sps:$4 sm:$0xff]   ;;  %v4440_v22 = vld [vmem:[%s6235_s1 + $0xf8] ss:$28 sps:$4 sm:$0xff]  }
 0x16e   :  { %v2407_v8 = vpop.f32.mrf.mxu0  ;;  %v2696_v63 = vpop.f32.mrf.mxu1 }
 0x16f   :  { %6252 = vst [vmem:[#allocation12_spill] sm:$0xff] %v5644_v50  ;;  %v2408_v30 = vadd.f32 %v2407_v8, %v5200_v3  ;;  %v5663_v3 = vpop.permute.xlu1 %715  ;;  %v631_v50 = vpop.permute.xlu0 %630 }
 0x170   :  { %v2409_v46 = vpop.f32.mrf.mxu0  ;;  %v2698_v32 = vpop.f32.mrf.mxu1 }
 0x171   :  { %v5661_v52 = vadd.f32 %v2696_v63, %v2408_v30  ;;  %v4437_v30 = vld [vmem:[%s6235_s1 + $0x198] ss:$28 sps:$4 sm:$0xff]  }
 0x172   :  { %v2412_v12 = vpop.f32.mrf.mxu0  ;;  %2925 = vmatmul.mubr.bf16.gmra.mxu0 %v4432_v10  ;;  %v2701_v5 = vpop.f32.mrf.mxu1  ;;  %4054 = vmatmul.mubr.bf16.gmra.mxu1 %v4436_v26  ;;  %v4444_v26 = vld [vmem:[%s6235_s1 + $0x1d4] ss:$28 sps:$4 sm:$0xff]  }
 0x173   :  { %6253 = vst [vmem:[#allocation13_spill] sm:$0xff] %v5661_v52  ;;  %v2413_v8 = vadd.f32 %v2412_v12, %v5148_v49  ;;  %2932 = vmatprep.mubr.bf16.mxu0 %v4439_v56  ;;  %4057 = vmatprep.mubr.bf16.mxu1 %v4440_v22  ;;  %v4441_v49 = vld [vmem:[%s6235_s1 + $0x130] ss:$28 sps:$4 sm:$0xff]   ;;  %v636_v22 = vpop.permute.xlu1 %635 }
 0x174   :  { %v2414_v19 = vpop.f32.mrf.mxu0  ;;  %v2703_v9 = vpop.f32.mrf.mxu1 }
 0x175   :  { %v5666_v46 = vadd.f32 %v2701_v5, %v2413_v8  ;;  %v4445_v9 = vld [vmem:[%s6235_s1 + $0x168] ss:$28 sps:$4 sm:$0xff]  }
 0x176   :  { %v2415_v57 = vpop.f32.mrf.mxu0  ;;  %v2704_v63 = vpop.f32.mrf.mxu1 }
 0x177   :  { %6254 = vst [vmem:[#allocation14_spill] sm:$0xff] %v5666_v46  ;;  %v2416_v10 = vadd.f32 %v2415_v57, %v5163_v54  ;;  %v5683_v54 = vpop.permute.xlu0 %700 }
 0x178   :  { %v2417_v56 = vpop.f32.mrf.mxu0  ;;  %v2706_v12 = vpop.f32.mrf.mxu1 }
 0x179   :  { %v5681_v32 = vadd.f32 %v2704_v63, %v2416_v10  ;;  %v4442_v10 = vld [vmem:[%s6235_s1 + $0x1d0] ss:$28 sps:$4 sm:$0xff]   ;;  %v5691_v63 = vpop.permute.xlu1 %705 }
 0x17a   :  { %v2420_v8 = vpop.f32.mrf.mxu0  ;;  %2933 = vmatmul.mubr.bf16.gmra.mxu0 %v4437_v30  ;;  %v2709_v5 = vpop.f32.mrf.mxu1  ;;  %4058 = vmatmul.mubr.bf16.gmra.mxu1 %v4441_v49  ;;  %v4449_v49 = vld [vmem:[%s6235_s1 + $0x20c] ss:$28 sps:$4 sm:$0xff]  }
 0x17b   :  { %6255 = vst [vmem:[#allocation15_spill] sm:$0xff] %v5681_v32  ;;  %v2421_v57 = vadd.f32 %v2420_v8, %v5118_v39  ;;  %2940 = vmatprep.mubr.bf16.mxu0 %v4444_v26  ;;  %4061 = vmatprep.mubr.bf16.mxu1 %v4445_v9  ;;  %v4446_v39 = vld [vmem:[%s6235_s1 + $0x1a0] ss:$28 sps:$4 sm:$0xff]   ;;  %v4450_v9 = vld [vmem:[%s6235_s1 + $0x1d8] ss:$28 sps:$4 sm:$0xff]  }
 0x17c   :  { %v2422_v19 = vpop.f32.mrf.mxu0  ;;  %v2711_v46 = vpop.f32.mrf.mxu1 }
 0x17d   :  { %v5686_v56 = vadd.f32 %v2709_v5, %v2421_v57  ;;  %v621_v46 = vpop.permute.xlu0 %620 }
 0x17e   :  { %v2423_v52 = vpop.f32.mrf.mxu0  ;;  %v2712_v12 = vpop.f32.mrf.mxu1 }
 0x17f   :  { %6256 = vst [vmem:[#allocation16_spill] sm:$0xff] %v5686_v56  ;;  %v2424_v30 = vadd.f32 %v2423_v52, %v5130_v43  ;;  %v626_v56 = vpop.permute.xlu1 %625 }
 0x180   :  { %v2425_v26 = vpop.f32.mrf.mxu0  ;;  %v2714_v57 = vpop.f32.mrf.mxu1 }
 0x181   :  { %v5703_v8 = vadd.f32 %v2712_v12, %v2424_v30 }
 0x182   :  { %v2428_v5 = vpop.f32.mrf.mxu0  ;;  %2941 = vmatmul.mubr.bf16.gmra.mxu0 %v4442_v10  ;;  %v2717_v52 = vpop.f32.mrf.mxu1  ;;  %4062 = vmatmul.mubr.bf16.gmra.mxu1 %v4446_v39  ;;  %v4451_v10 = vld [vmem:[%s6235_s1 + $0x210] ss:$28 sps:$4 sm:$0xff]   ;;  %v4454_v39 = vld [vmem:[%s6235_s1 + $0x244] ss:$28 sps:$4 sm:$0xff]  }
 0x183   :  { %v2429_v43 = vadd.f32 %v2428_v5, %v621_v46  ;;  %2948 = vmatprep.mubr.bf16.mxu0 %v4449_v49  ;;  %4065 = vmatprep.mubr.bf16.mxu1 %v4450_v9  ;;  %v4455_v46 = vld [vmem:[%s6235_s1 + $0x248] ss:$28 sps:$4 sm:$0xff]  }
 0x184   :  { %v2430_v19 = vpop.f32.mrf.mxu0  ;;  %v2719_v26 = vpop.f32.mrf.mxu1 }
 0x185   :  { %v5705_v32 = vadd.f32 %v2717_v52, %v2429_v43 }
 0x186   :  { %v2431_v2 = vpop.f32.mrf.mxu0  ;;  %v2720_v12 = vpop.f32.mrf.mxu1 }
 0x187   :  { %6257 = vst [vmem:[#allocation17_spill] sm:$0xff] %v5705_v32  ;;  %v2432_v30 = vadd.f32 %v2431_v2, %v626_v56 }
 0x188   :  { %v2433_v49 = vpop.f32.mrf.mxu0  ;;  %v2722_v57 = vpop.f32.mrf.mxu1 }
 0x189   :  { %v5719_v9 = vadd.f32 %v2720_v12, %v2432_v30  ;;  %v4452_v49 = vld [vmem:[%s6235_s1 + $0x240] ss:$28 sps:$4 sm:$0xff]  }
 0x18a   :  { %v2436_v5 = vpop.f32.mrf.mxu0  ;;  %2949 = vmatmul.mubr.bf16.gmra.mxu0 %v4447_v38  ;;  %v2725_v56 = vpop.f32.mrf.mxu1  ;;  %4066 = vmatmul.mubr.bf16.gmra.mxu1 %v4451_v10  ;;  %v4456_v38 = vld [vmem:[%s6235_s1 + $0x280] ss:$28 sps:$4 sm:$0xff]   ;;  %v4460_v10 = vld [vmem:[%s6235_s1 + $0x2b8] ss:$28 sps:$4 sm:$0xff]  }
 0x18b   :  { %v2437_v2 = vadd.f32 %v2436_v5, %v631_v50  ;;  %2956 = vmatprep.mubr.bf16.mxu0 %v4454_v39  ;;  %4069 = vmatprep.mubr.bf16.mxu1 %v4455_v46  ;;  %v4459_v50 = vld [vmem:[%s6235_s1 + $0x27c] ss:$28 sps:$4 sm:$0xff]  }
 0x18c   :  { %v2438_v43 = vpop.f32.mrf.mxu0  ;;  %v2727_v19 = vpop.f32.mrf.mxu1 }
 0x18d   :  { %v5721_v52 = vadd.f32 %v2725_v56, %v2437_v2 }
 0x18e   :  { %v2439_v26 = vpop.f32.mrf.mxu0  ;;  %v2728_v30 = vpop.f32.mrf.mxu1 }
 0x18f   :  { %v2440_v32 = vadd.f32 %v2439_v26, %v636_v22  ;;  %v4457_v26 = vld [vmem:[%s6235_s1 + $0x278] ss:$28 sps:$4 sm:$0xff]  }
 0x190   :  { %v2441_v12 = vpop.f32.mrf.mxu0  ;;  %v2730_v46 = vpop.f32.mrf.mxu1 }
 0x191   :  { %v5735_v39 = vadd.f32 %v2728_v30, %v2440_v32 }
 0x192   :  { %v2444_v57 = vpop.f32.mrf.mxu0  ;;  %2957 = vmatmul.mubr.bf16.gmra.mxu0 %v4452_v49  ;;  %v2733_v5 = vpop.f32.mrf.mxu1  ;;  %4070 = vmatmul.mubr.bf16.gmra.mxu1 %v4456_v38  ;;  %v4464_v49 = vld [vmem:[%s6235_s1 + $0x2b4] ss:$28 sps:$4 sm:$0xff]  }
 0x193   :  { %v2445_v22 = vadd.f32 %v2444_v57, %v5637_v16  ;;  %2964 = vmatprep.mubr.bf16.mxu0 %v4459_v50  ;;  %4073 = vmatprep.mubr.bf16.mxu1 %v4460_v10  ;;  %v4461_v16 = vld [vmem:[%s6235_s1 + $0x2f0] ss:$28 sps:$4 sm:$0xff]   ;;  %v4465_v50 = vld [vmem:[%s6235_s1 + $0x328] ss:$28 sps:$4 sm:$0xff]  }
 0x194   :  { %v2446_v2 = vpop.f32.mrf.mxu0  ;;  %v2735_v43 = vpop.f32.mrf.mxu1 }
 0x195   :  { %v5738_v56 = vadd.f32 %v2733_v5, %v2445_v22 }
 0x196   :  { %v2447_v19 = vpop.f32.mrf.mxu0  ;;  %v2736_v30 = vpop.f32.mrf.mxu1 }
 0x197   :  { %v2448_v32 = vadd.f32 %v2447_v19, %v5642_v60  ;;  %v4462_v19 = vld [vmem:[%s6235_s1 + $0x2b0] ss:$28 sps:$4 sm:$0xff]  }
 0x198   :  { %v2449_v38 = vpop.f32.mrf.mxu0  ;;  %v2738_v10 = vpop.f32.mrf.mxu1 }
 0x199   :  { %v5753_v12 = vadd.f32 %v2736_v30, %v2448_v32 }
 0x19a   :  { %v2452_v46 = vpop.f32.mrf.mxu0  ;;  %2965 = vmatmul.mubr.bf16.gmra.mxu0 %v4457_v26  ;;  %v2741_v57 = vpop.f32.mrf.mxu1  ;;  %4074 = vmatmul.mubr.bf16.gmra.mxu1 %v4461_v16  ;;  %v4469_v26 = vld [vmem:[%s6235_s1 + $0x2ec] ss:$28 sps:$4 sm:$0xff]  }
 0x19b   :  { %v2453_v60 = vadd.f32 %v2452_v46, %v5593_v44  ;;  %2972 = vmatprep.mubr.bf16.mxu0 %v4464_v49  ;;  %4077 = vmatprep.mubr.bf16.mxu1 %v4465_v50  ;;  %v4466_v44 = vld [vmem:[%s6235_s1 + $0x360] ss:$28 sps:$4 sm:$0xff]   ;;  %v4470_v49 = vld [vmem:[%s6235_s1 + $0x398] ss:$28 sps:$4 sm:$0xff]  }
 0x19c   :  { %v2454_v22 = vpop.f32.mrf.mxu0  ;;  %v2743_v2 = vpop.f32.mrf.mxu1 }
 0x19d   :  { %v5756_v5 = vadd.f32 %v2741_v57, %v2453_v60 }
 0x19e   :  { %v2455_v43 = vpop.f32.mrf.mxu0  ;;  %v2744_v30 = vpop.f32.mrf.mxu1 }
 0x19f   :  { %v2456_v32 = vadd.f32 %v2455_v43, %v5610_v48  ;;  %v4467_v43 = vld [vmem:[%s6235_s1 + $0x2e8] ss:$28 sps:$4 sm:$0xff]  }
 0x1a0   :  { %v2457_v16 = vpop.f32.mrf.mxu0  ;;  %v2746_v50 = vpop.f32.mrf.mxu1 }
 0x1a1   :  { %v5771_v38 = vadd.f32 %v2744_v30, %v2456_v32 }
 0x1a2   :  { %v2460_v10 = vpop.f32.mrf.mxu0  ;;  %2973 = vmatmul.mubr.bf16.gmra.mxu0 %v4462_v19  ;;  %v2749_v46 = vpop.f32.mrf.mxu1  ;;  %4078 = vmatmul.mubr.bf16.gmra.mxu1 %v4466_v44  ;;  %v4474_v19 = vld [vmem:[%s6235_s1 + $0x324] ss:$28 sps:$4 sm:$0xff]  }
 0x1a3   :  { %v2461_v48 = vadd.f32 %v2460_v10, %v5555_v55  ;;  %2980 = vmatprep.mubr.bf16.mxu0 %v4469_v26  ;;  %4081 = vmatprep.mubr.bf16.mxu1 %v4470_v49  ;;  %v4471_v55 = vld [vmem:[%s6235_s1 + $0x3d0] ss:$28 sps:$4 sm:$0xff]   ;;  %v4475_v26 = vld [vmem:[%s6235_s1 + $0x408] ss:$28 sps:$4 sm:$0xff]  }
 0x1a4   :  { %v2462_v60 = vpop.f32.mrf.mxu0  ;;  %v2751_v22 = vpop.f32.mrf.mxu1 }
 0x1a5   :  { %v5774_v57 = vadd.f32 %v2749_v46, %v2461_v48 }
 0x1a6   :  { %v2463_v2 = vpop.f32.mrf.mxu0  ;;  %v2752_v30 = vpop.f32.mrf.mxu1 }
 0x1a7   :  { %v2464_v32 = vadd.f32 %v2463_v2, %v5563_v36  ;;  %v4472_v2 = vld [vmem:[%s6235_s1 + $0x320] ss:$28 sps:$4 sm:$0xff]  }
 0x1a8   :  { %v2465_v44 = vpop.f32.mrf.mxu0  ;;  %v2754_v49 = vpop.f32.mrf.mxu1 }
 0x1a9   :  { %v5789_v16 = vadd.f32 %v2752_v30, %v2464_v32 }
 0x1aa   :  { %v2468_v50 = vpop.f32.mrf.mxu0  ;;  %2981 = vmatmul.mubr.bf16.gmra.mxu0 %v4467_v43  ;;  %v2757_v10 = vpop.f32.mrf.mxu1  ;;  %4082 = vmatmul.mubr.bf16.gmra.mxu1 %v4471_v55  ;;  %v4479_v43 = vld [vmem:[%s6235_s1 + $0x35c] ss:$28 sps:$4 sm:$0xff]  }
 0x1ab   :  { %v2469_v36 = vadd.f32 %v2468_v50, %v5505_v27  ;;  %2988 = vmatprep.mubr.bf16.mxu0 %v4474_v19  ;;  %4085 = vmatprep.mubr.bf16.mxu1 %v4475_v26  ;;  %v4476_v27 = vld [vmem:[%s6235_s1 + $0x440] ss:$28 sps:$4 sm:$0xff]   ;;  %v4480_v19 = vld [vmem:[%s6235_s1 + $0x478] ss:$28 sps:$4 sm:$0xff]  }
 0x1ac   :  { %v2470_v48 = vpop.f32.mrf.mxu0  ;;  %v2759_v60 = vpop.f32.mrf.mxu1 }
 0x1ad   :  { %v5792_v46 = vadd.f32 %v2757_v10, %v2469_v36 }
 0x1ae   :  { %v2471_v22 = vpop.f32.mrf.mxu0  ;;  %v2760_v30 = vpop.f32.mrf.mxu1 }
 0x1af   :  { %6258 = vst [vmem:[#allocation18_spill] sm:$0xff] %v5792_v46  ;;  %v2472_v32 = vadd.f32 %v2471_v22, %v5525_v41  ;;  %v4477_v22 = vld [vmem:[%s6235_s1 + $0x358] ss:$28 sps:$4 sm:$0xff]  }
 0x1b0   :  { %v2473_v55 = vpop.f32.mrf.mxu0  ;;  %v2762_v26 = vpop.f32.mrf.mxu1 }
 0x1b1   :  { %v5807_v44 = vadd.f32 %v2760_v30, %v2472_v32 }
 0x1b2   :  { %v2476_v49 = vpop.f32.mrf.mxu0  ;;  %2989 = vmatmul.mubr.bf16.gmra.mxu0 %v4472_v2  ;;  %v2765_v50 = vpop.f32.mrf.mxu1  ;;  %4086 = vmatmul.mubr.bf16.gmra.mxu1 %v4476_v27  ;;  %v4484_v2 = vld [vmem:[%s6235_s1 + $0x394] ss:$28 sps:$4 sm:$0xff]  }
 0x1b3   :  { %6259 = vst [vmem:[#allocation19_spill] sm:$0xff] %v5807_v44  ;;  %v2477_v41 = vadd.f32 %v2476_v49, %v5472_v37  ;;  %2996 = vmatprep.mubr.bf16.mxu0 %v4479_v43  ;;  %4089 = vmatprep.mubr.bf16.mxu1 %v4480_v19  ;;  %v4481_v37 = vld [vmem:[%s6235_s1 + $0x4b0] ss:$28 sps:$4 sm:$0xff]   ;;  %v4485_v43 = vld [vmem:[%s6235_s1 + $0x4e8] ss:$28 sps:$4 sm:$0xff]  }
 0x1b4   :  { %v2478_v36 = vpop.f32.mrf.mxu0  ;;  %v2767_v48 = vpop.f32.mrf.mxu1 }
 0x1b5   :  { %v5810_v10 = vadd.f32 %v2765_v50, %v2477_v41 }
 0x1b6   :  { %v2479_v60 = vpop.f32.mrf.mxu0  ;;  %v2768_v30 = vpop.f32.mrf.mxu1 }
 0x1b7   :  { %6260 = vst [vmem:[#allocation20_spill] sm:$0xff] %v5810_v10  ;;  %v2480_v32 = vadd.f32 %v2479_v60, %v5477_v24  ;;  %v4482_v60 = vld [vmem:[%s6235_s1 + $0x390] ss:$28 sps:$4 sm:$0xff]   ;;  %v6285_v10 = vld [vmem:[#allocation14_spill] sm:$0xff] }
 0x1b8   :  { %v2481_v27 = vpop.f32.mrf.mxu0  ;;  %v2770_v19 = vpop.f32.mrf.mxu1 }
 0x1b9   :  { %v5825_v55 = vadd.f32 %v2768_v30, %v2480_v32 }
 0x1ba   :  { %v2484_v26 = vpop.f32.mrf.mxu0  ;;  %2997 = vmatmul.mubr.bf16.gmra.mxu0 %v4477_v22  ;;  %v2773_v49 = vpop.f32.mrf.mxu1  ;;  %4090 = vmatmul.mubr.bf16.gmra.mxu1 %v4481_v37  ;;  %v4489_v22 = vld [vmem:[%s6235_s1 + $0x3cc] ss:$28 sps:$4 sm:$0xff]  }
 0x1bb   :  { %6261 = vst [vmem:[#allocation21_spill] sm:$0xff] %v5825_v55  ;;  %v2485_v24 = vadd.f32 %v2484_v26, %v5431_v33  ;;  %3004 = vmatprep.mubr.bf16.mxu0 %v4484_v2  ;;  %4093 = vmatprep.mubr.bf16.mxu1 %v4485_v43  ;;  %v4486_v33 = vld [vmem:[%s6235_s1 + $0x520] ss:$28 sps:$4 sm:$0xff]   ;;  %v4490_v2 = vld [vmem:[%s6235_s1 + $0x558] ss:$28 sps:$4 sm:$0xff]  }
 0x1bc   :  { %v2486_v41 = vpop.f32.mrf.mxu0  ;;  %v2775_v36 = vpop.f32.mrf.mxu1 }
 0x1bd   :  { %v5828_v50 = vadd.f32 %v2773_v49, %v2485_v24 }
 0x1be   :  { %v2487_v48 = vpop.f32.mrf.mxu0  ;;  %v2776_v30 = vpop.f32.mrf.mxu1 }
 0x1bf   :  { %6262 = vst [vmem:[#allocation22_spill] sm:$0xff] %v5828_v50  ;;  %v2488_v32 = vadd.f32 %v2487_v48, %v5448_v59  ;;  %v4487_v48 = vld [vmem:[%s6235_s1 + $0x3c8] ss:$28 sps:$4 sm:$0xff]  }
 0x1c0   :  { %v2489_v37 = vpop.f32.mrf.mxu0  ;;  %v2778_v43 = vpop.f32.mrf.mxu1 }
 0x1c1   :  { %v5843_v27 = vadd.f32 %v2776_v30, %v2488_v32 }
 0x1c2   :  { %v2492_v19 = vpop.f32.mrf.mxu0  ;;  %3005 = vmatmul.mubr.bf16.gmra.mxu0 %v4482_v60  ;;  %v2781_v26 = vpop.f32.mrf.mxu1  ;;  %4094 = vmatmul.mubr.bf16.gmra.mxu1 %v4486_v33  ;;  %v4494_v60 = vld [vmem:[%s6235_s1 + $0x404] ss:$28 sps:$4 sm:$0xff]  }
 0x1c3   :  { %6263 = vst [vmem:[#allocation23_spill] sm:$0xff] %v5843_v27  ;;  %v2493_v59 = vadd.f32 %v2492_v19, %v5683_v54  ;;  %3012 = vmatprep.mubr.bf16.mxu0 %v4489_v22  ;;  %4097 = vmatprep.mubr.bf16.mxu1 %v4490_v2  ;;  %v4491_v54 = vld [vmem:[%s6235_s1 + $0x590] ss:$28 sps:$4 sm:$0xff]   ;;  %v4495_v22 = vld [vmem:[%s6235_s1 + $0x5c8] ss:$28 sps:$4 sm:$0xff]  }
 0x1c4   :  { %v2494_v24 = vpop.f32.mrf.mxu0  ;;  %v2783_v41 = vpop.f32.mrf.mxu1  ;;  %v6282_v27 = vld [vmem:[#allocation11_spill] sm:$0xff] }
 0x1c5   :  { %v5846_v49 = vadd.f32 %v2781_v26, %v2493_v59 }
 0x1c6   :  { %v2495_v36 = vpop.f32.mrf.mxu0  ;;  %v2784_v30 = vpop.f32.mrf.mxu1 }
 0x1c7   :  { %6264 = vst [vmem:[#allocation24_spill] sm:$0xff] %v5846_v49  ;;  %v2496_v32 = vadd.f32 %v2495_v36, %v5691_v63  ;;  %v4492_v36 = vld [vmem:[%s6235_s1 + $0x400] ss:$28 sps:$4 sm:$0xff]  }
 0x1c8   :  { %v2497_v33 = vpop.f32.mrf.mxu0  ;;  %v2786_v2 = vpop.f32.mrf.mxu1  ;;  %v6281_v49 = vld [vmem:[#allocation10_spill] sm:$0xff] }
 0x1c9   :  { %v5861_v37 = vadd.f32 %v2784_v30, %v2496_v32 }
 0x1ca   :  { %v2500_v43 = vpop.f32.mrf.mxu0  ;;  %3013 = vmatmul.mubr.bf16.gmra.mxu0 %v4487_v48  ;;  %v2789_v19 = vpop.f32.mrf.mxu1  ;;  %4098 = vmatmul.mubr.bf16.gmra.mxu1 %v4491_v54  ;;  %v4499_v48 = vld [vmem:[%s6235_s1 + $0x43c] ss:$28 sps:$4 sm:$0xff]  }
 0x1cb   :  { %6265 = vst [vmem:[#allocation25_spill] sm:$0xff] %v5861_v37  ;;  %v2501_v63 = vadd.f32 %v2500_v43, %v5649_v51  ;;  %3020 = vmatprep.mubr.bf16.mxu0 %v4494_v60  ;;  %4101 = vmatprep.mubr.bf16.mxu1 %v4495_v22  ;;  %v4496_v51 = vld [vmem:[%s6235_s1 + $0x600] ss:$28 sps:$4 sm:$0xff]   ;;  %v4500_v60 = vld [vmem:[%s6235_s1 + $0x638] ss:$28 sps:$4 sm:$0xff]  }
 0x1cc   :  { %v2502_v59 = vpop.f32.mrf.mxu0  ;;  %v2791_v24 = vpop.f32.mrf.mxu1 }
 0x1cd   :  { %v5864_v26 = vadd.f32 %v2789_v19, %v2501_v63 }
 0x1ce   :  { %v2503_v41 = vpop.f32.mrf.mxu0  ;;  %v2792_v30 = vpop.f32.mrf.mxu1 }
 0x1cf   :  { %6266 = vst [vmem:[#allocation26_spill] sm:$0xff] %v5864_v26  ;;  %v2504_v32 = vadd.f32 %v2503_v41, %v5663_v3  ;;  %v4497_v41 = vld [vmem:[%s6235_s1 + $0x438] ss:$28 sps:$4 sm:$0xff]  }
 0x1d0   :  { %v2505_v54 = vpop.f32.mrf.mxu0  ;;  %v2794_v22 = vpop.f32.mrf.mxu1 }
 0x1d1   :  { %v5879_v33 = vadd.f32 %v2792_v30, %v2504_v32 }
 0x1d2   :  { %v2508_v2 = vpop.f32.mrf.mxu0  ;;  %3021 = vmatmul.mubr.bf16.gmra.mxu0 %v4492_v36  ;;  %v2797_v43 = vpop.f32.mrf.mxu1  ;;  %4102 = vmatmul.mubr.bf16.gmra.mxu1 %v4496_v51  ;;  %v4504_v36 = vld [vmem:[%s6235_s1 + $0x474] ss:$28 sps:$4 sm:$0xff]  }
 0x1d3   :  { %6267 = vst [vmem:[#allocation27_spill] sm:$0xff] %v5879_v33  ;;  %v2509_v3 = vadd.f32 %v2508_v2, %v5614_v58  ;;  %3028 = vmatprep.mubr.bf16.mxu0 %v4499_v48  ;;  %4105 = vmatprep.mubr.bf16.mxu1 %v4500_v60  ;;  %v4501_v58 = vld [vmem:[%s6235_s1 + $0x670] ss:$28 sps:$4 sm:$0xff]   ;;  %v4505_v48 = vld [vmem:[%s6235_s1 + $0x6a8] ss:$28 sps:$4 sm:$0xff]  }
 0x1d4   :  { %v2510_v63 = vpop.f32.mrf.mxu0  ;;  %v2799_v59 = vpop.f32.mrf.mxu1 }
 0x1d5   :  { %v5882_v19 = vadd.f32 %v2797_v43, %v2509_v3 }
 0x1d6   :  { %v2511_v24 = vpop.f32.mrf.mxu0  ;;  %v2800_v30 = vpop.f32.mrf.mxu1 }
 0x1d7   :  { %6268 = vst [vmem:[#allocation28_spill] sm:$0xff] %v5882_v19  ;;  %v2512_v32 = vadd.f32 %v2511_v24, %v5625_v23  ;;  %v4502_v24 = vld [vmem:[%s6235_s1 + $0x470] ss:$28 sps:$4 sm:$0xff]  }
 0x1d8   :  { %v2513_v51 = vpop.f32.mrf.mxu0  ;;  %v2802_v60 = vpop.f32.mrf.mxu1 }
 0x1d9   :  { %v5897_v54 = vadd.f32 %v2800_v30, %v2512_v32 }
 0x1da   :  { %v2516_v22 = vpop.f32.mrf.mxu0  ;;  %3029 = vmatmul.mubr.bf16.gmra.mxu0 %v4497_v41  ;;  %v2805_v2 = vpop.f32.mrf.mxu1  ;;  %4106 = vmatmul.mubr.bf16.gmra.mxu1 %v4501_v58  ;;  %v4509_v41 = vld [vmem:[%s6235_s1 + $0x4ac] ss:$28 sps:$4 sm:$0xff]  }
 0x1db   :  { %6269 = vst [vmem:[#allocation29_spill] sm:$0xff] %v5897_v54  ;;  %v2517_v23 = vadd.f32 %v2516_v22, %v5573_v45  ;;  %3036 = vmatprep.mubr.bf16.mxu0 %v4504_v36  ;;  %4109 = vmatprep.mubr.bf16.mxu1 %v4505_v48  ;;  %v4506_v45 = vld [vmem:[%s6235_s1 + $0x6e0] ss:$28 sps:$4 sm:$0xff]  }
 0x1dc   :  { %v2518_v3 = vpop.f32.mrf.mxu0  ;;  %v2807_v63 = vpop.f32.mrf.mxu1 }
 0x1dd   :  { %v5900_v43 = vadd.f32 %v2805_v2, %v2517_v23  ;;  %v4507_v63 = vld [vmem:[%s6235_s1 + $0x4a8] ss:$28 sps:$4 sm:$0xff]  }
 0x1de   :  { %v2519_v59 = vpop.f32.mrf.mxu0  ;;  %v2808_v30 = vpop.f32.mrf.mxu1 }
 0x1df   :  { %v2520_v32 = vadd.f32 %v2519_v59, %v5590_v0 }
 0x1e0   :  { %v2521_v58 = vpop.f32.mrf.mxu0  ;;  %v2810_v51 = vpop.f32.mrf.mxu1 }
 0x1e1   :  { %v5912_v36 = vadd.f32 %v2808_v30, %v2520_v32 }
 0x1e2   :  { %v2524_v48 = vpop.f32.mrf.mxu0  ;;  %3037 = vmatmul.mubr.bf16.gmra.mxu0 %v4502_v24  ;;  %v2813_v22 = vpop.f32.mrf.mxu1  ;;  %4110 = vmatmul.mubr.bf16.gmra.mxu1 %v4506_v45  ;;  %v4512_v24 = vld [vmem:[%s6235_s1 + $0x4e4] ss:$28 sps:$4 sm:$0xff]  }
 0x1e3   :  { %v2525_v60 = vadd.f32 %v2524_v48, %v5532_v14  ;;  %3044 = vmatprep.mubr.bf16.mxu0 %v4509_v41 }
 0x1e4   :  { %v2526_v0 = vpop.f32.mrf.mxu0  ;;  %v2815_v2 = vpop.f32.mrf.mxu1 }
 0x1e5   :  { %v5915_v23 = vadd.f32 %v2813_v22, %v2525_v60  ;;  %v4510_v0 = vld [vmem:[%s6235_s1 + $0x4e0] ss:$28 sps:$4 sm:$0xff]  }
 0x1e6   :  { %v2527_v3 = vpop.f32.mrf.mxu0  ;;  %v2816_v32 = vpop.f32.mrf.mxu1 }
 0x1e7   :  { %v2528_v59 = vadd.f32 %v2527_v3, %v5543_v40 }
 0x1e8   :  { %v2529_v14 = vpop.f32.mrf.mxu0  ;;  %v2818_v45 = vpop.f32.mrf.mxu1 }
 0x1e9   :  { %v5924_v30 = vadd.f32 %v2816_v32, %v2528_v59 }
 0x1ea   :  { %v2532_v41 = vpop.f32.mrf.mxu0  ;;  %3045 = vmatmul.mubr.bf16.gmra.mxu0 %v4507_v63  ;;  %v2821_v51 = vpop.f32.mrf.mxu1  ;;  %v4515_v63 = vld [vmem:[%s6235_s1 + $0x51c] ss:$28 sps:$4 sm:$0xff]  }
 0x1eb   :  { %v2533_v58 = vadd.f32 %v2532_v41, %v5484_v29  ;;  %3052 = vmatprep.mubr.bf16.mxu0 %v4512_v24 }
 0x1ec   :  { %v2534_v48 = vpop.f32.mrf.mxu0  ;;  %v2823_v22 = vpop.f32.mrf.mxu1 }
 0x1ed   :  { %v5927_v60 = vadd.f32 %v2821_v51, %v2533_v58  ;;  %v4513_v48 = vld [vmem:[%s6235_s1 + $0x518] ss:$28 sps:$4 sm:$0xff]  }
 0x1ee   :  { %v2535_v40 = vpop.f32.mrf.mxu0  ;;  %v2824_v3 = vpop.f32.mrf.mxu1 }
 0x1ef   :  { %v2536_v2 = vadd.f32 %v2535_v40, %v5501_v20 }
 0x1f0   :  { %v2537_v59 = vpop.f32.mrf.mxu0  ;;  %v2826_v32 = vpop.f32.mrf.mxu1 }
 0x1f1   :  { %v5936_v29 = vadd.f32 %v2824_v3, %v2536_v2 }
 0x1f2   :  { %v2540_v24 = vpop.f32.mrf.mxu0  ;;  %3053 = vmatmul.mubr.bf16.gmra.mxu0 %v4510_v0  ;;  %v2829_v45 = vpop.f32.mrf.mxu1  ;;  %v4518_v0 = vld [vmem:[%s6235_s1 + $0x554] ss:$28 sps:$4 sm:$0xff]  }
 0x1f3   :  { %v2541_v14 = vadd.f32 %v2540_v24, %v5452_v1  ;;  %3060 = vmatprep.mubr.bf16.mxu0 %v4515_v63 }
 0x1f4   :  { %v2542_v41 = vpop.f32.mrf.mxu0  ;;  %v2831_v51 = vpop.f32.mrf.mxu1 }
 0x1f5   :  { %v5939_v58 = vadd.f32 %v2829_v45, %v2541_v14  ;;  %v4516_v41 = vld [vmem:[%s6235_s1 + $0x550] ss:$28 sps:$4 sm:$0xff]  }
 0x1f6   :  { %v2543_v20 = vpop.f32.mrf.mxu0  ;;  %v2832_v40 = vpop.f32.mrf.mxu1 }
 0x1f7   :  { %v2544_v22 = vadd.f32 %v2543_v20, %v5460_v18 }
 0x1f8   :  { %v2545_v2 = vpop.f32.mrf.mxu0  ;;  %v2834_v3 = vpop.f32.mrf.mxu1 }
 0x1f9   :  { %v5948_v1 = vadd.f32 %v2832_v40, %v2544_v22 }
 0x1fa   :  { %v2548_v63 = vpop.f32.mrf.mxu0  ;;  %3061 = vmatmul.mubr.bf16.gmra.mxu0 %v4513_v48  ;;  %v2837_v32 = vpop.f32.mrf.mxu1  ;;  %v4521_v48 = vld [vmem:[%s6235_s1 + $0x58c] ss:$28 sps:$4 sm:$0xff]  }
 0x1fb   :  { %v2549_v59 = vadd.f32 %v2548_v63, %v5414_v11  ;;  %3068 = vmatprep.mubr.bf16.mxu0 %v4518_v0 }
 0x1fc   :  { %v2550_v24 = vpop.f32.mrf.mxu0  ;;  %v2839_v45 = vpop.f32.mrf.mxu1 }
 0x1fd   :  { %v5951_v14 = vadd.f32 %v2837_v32, %v2549_v59  ;;  %v4519_v24 = vld [vmem:[%s6235_s1 + $0x588] ss:$28 sps:$4 sm:$0xff]  }
 0x1fe   :  { %v2551_v18 = vpop.f32.mrf.mxu0  ;;  %v2840_v20 = vpop.f32.mrf.mxu1 }
 0x1ff   :  { %v2552_v51 = vadd.f32 %v2551_v18, %v5428_v17 }
 0x200   :  { %v2553_v22 = vpop.f32.mrf.mxu0  ;;  %v2842_v40 = vpop.f32.mrf.mxu1 }
 0x201   :  { %v5960_v11 = vadd.f32 %v2840_v20, %v2552_v51 }
 0x202   :  { %v2878_v0 = vpop.f32.mrf.mxu0  ;;  %3069 = vmatmul.mubr.bf16.gmra.mxu0 %v4516_v41  ;;  %v3094_v3 = vpop.f32.mrf.mxu1 }
 0x203   :  { %v5963_v2 = vadd.f32 %v2878_v0, %v5340_v13  ;;  %3076 = vmatprep.mubr.bf16.mxu0 %v4521_v48  ;;  %v5966_v63 = vadd.f32 %v3094_v3, %v5900_v43  ;;  %v4524_v13 = vld [vmem:[%s6235_s1 + $0x5c4] ss:$28 sps:$4 sm:$0xff]  }
 0x204   :  { %v2880_v17 = vpop.f32.mrf.mxu0  ;;  %v3096_v59 = vpop.f32.mrf.mxu1 }
 0x206   :  { %v2881_v32 = vpop.f32.mrf.mxu0  ;;  %v3097_v18 = vpop.f32.mrf.mxu1 }
 0x207   :  { %v5972_v45 = vadd.f32 %v2881_v32, %v5354_v28  ;;  %v5978_v41 = vadd.f32 %v3097_v18, %v5912_v36  ;;  %v4522_v36 = vld [vmem:[%s6235_s1 + $0x5c0] ss:$28 sps:$4 sm:$0xff]  }
 0x208   :  { %v2883_v43 = vpop.f32.mrf.mxu0  ;;  %v3099_v51 = vpop.f32.mrf.mxu1 }
 0x20a   :  { %v2886_v20 = vpop.f32.mrf.mxu0  ;;  %3077 = vmatmul.mubr.bf16.gmra.mxu0 %v4519_v24  ;;  %v3102_v22 = vpop.f32.mrf.mxu1 }
 0x20b   :  { %v5981_v48 = vadd.f32 %v2886_v20, %v5356_v42  ;;  %3084 = vmatprep.mubr.bf16.mxu0 %v4524_v13  ;;  %v5984_v28 = vadd.f32 %v3102_v22, %v5915_v23 }
 0x20c   :  { %v2888_v40 = vpop.f32.mrf.mxu0  ;;  %v3104_v0 = vpop.f32.mrf.mxu1 }
 0x20e   :  { %v2889_v3 = vpop.f32.mrf.mxu0  ;;  %v3105_v59 = vpop.f32.mrf.mxu1 }
 0x20f   :  { %v5990_v17 = vadd.f32 %v2889_v3, %v5370_v62  ;;  %v5993_v32 = vadd.f32 %v3105_v59, %v5924_v30 }
 0x210   :  { %v2891_v42 = vpop.f32.mrf.mxu0  ;;  %v3107_v24 = vpop.f32.mrf.mxu1 }
 0x212   :  { %v2894_v18 = vpop.f32.mrf.mxu0  ;;  %3085 = vmatmul.mubr.bf16.gmra.mxu0 %v4522_v36  ;;  %v3110_v13 = vpop.f32.mrf.mxu1 }
 0x213   :  { %v5996_v23 = vadd.f32 %v2894_v18, %v5373_v6  ;;  %v5999_v43 = vadd.f32 %v3110_v13, %v5927_v60  ;;  %v4529_v18 = vmov 1983009808  }
 0x214   :  { %v2896_v51 = vpop.f32.mrf.mxu0  ;;  %v3112_v20 = vpop.f32.mrf.mxu1  ;;  %v3528_v13 = vunpack.c.l.s4 %v4529_v18 }
 0x215   :  { %v3530_v51 = vlaneseq }
 0x216   :  { %v2897_v22 = vpop.f32.mrf.mxu0  ;;  %v3113_v40 = vpop.f32.mrf.mxu1 }
 0x217   :  { %v6002_v62 = vadd.f32 %v2897_v22, %v5388_v25  ;;  %v6005_v30 = vadd.f32 %v3113_v40, %v5936_v29  ;;  %v3529_v29 = vunpack.c.0.s8 %v3528_v13  ;;  %v3531_v40 = vshrl.u32 %v3530_v51, 7 }
 0x218   :  { %v2899_v0 = vpop.f32.mrf.mxu0  ;;  %v3115_v3 = vpop.f32.mrf.mxu1 }
 0x21a   :  { %v2902_v36 = vpop.f32.mrf.mxu0  ;;  %v3118_v59 = vpop.f32.mrf.mxu1 }
 0x21b   :  { %v2903_v6 = vadd.f32 %v2902_v36, %v5391_v34  ;;  %v6009_v42 = vadd.f32 %v3118_v59, %v5939_v58  ;;  %v6015_v36 = vsub.s32 %v3529_v29, %v3531_v40  ;;  %v6020_v59 = vld [vmem:[%s6238_s3] sm:$0xff] }
 0x21c   :  { %v2904_v60 = vpop.f32.mrf.mxu0  ;;  %v3120_v24 = vpop.f32.mrf.mxu1 }
 0x21d   :  { %6270 = vst [vmem:[#allocation30_spill] sm:$0xff] %v6009_v42 }
 0x21e   :  { %v2905_v25 = vpop.f32.mrf.mxu0  ;;  %v3121_v22 = vpop.f32.mrf.mxu1 }
 0x21f   :  { %v2906_v20 = vadd.f32 %v2905_v25, %v5406_v47  ;;  %v6013_v0 = vadd.f32 %v3121_v22, %v5948_v1  ;;  %v6025_v47 = vrot.slane %v6020_v59, %v6015_v36 }
 0x220   :  { %v2907_v3 = vpop.f32.mrf.mxu0  ;;  %v3123_v34 = vpop.f32.mrf.mxu1 }
 0x221   :  { %6271 = vst [vmem:[#allocation31_spill] sm:$0xff] %v6013_v0  ;;  %v3541_v51 = vcombine.high %v6025_v47, %v6025_v47 }
 0x222   :  { %v2910_v58 = vpop.f32.mrf.mxu0  ;;  %v3126_v24 = vpop.f32.mrf.mxu1 }
 0x223   :  { %v2911_v60 = vadd.f32 %v2910_v58, %v5409_v53  ;;  %v6028_v1 = vadd.f32 %v3126_v24, %v5951_v14  ;;  %3579 = vmatprep.mubr.bf16.mxu1 %v3541_v51 }
 0x224   :  { %v2912_v18 = vpop.f32.mrf.mxu0  ;;  %v3128_v13 = vpop.f32.mrf.mxu1 }
 0x226   :  { %v2913_v25 = vpop.f32.mrf.mxu0  ;;  %v3129_v29 = vpop.f32.mrf.mxu1 }
 0x227   :  { %v2914_v22 = vadd.f32 %v2913_v25, %v5426_v21  ;;  %v6034_v53 = vadd.f32 %v3129_v29, %v5960_v11 }
 0x228   :  { %v2915_v40 = vpop.f32.mrf.mxu0  ;;  %v3131_v3 = vpop.f32.mrf.mxu1 }
 0x229   :  { %6272 = vst [vmem:[#allocation32_spill] sm:$0xff] %v6034_v53 }
 0x22a   :  { %v2918_v34 = vpop.f32.mrf.mxu0  ;;  %v4051_v14 = vpop.f32.mrf.mxu1 }
 0x22b   :  { %v2919_v58 = vadd.f32 %v2918_v34, %v5433_v35  ;;  %v3176_v24 = vadd.f32 %v4051_v14, %v5981_v48 }
 0x22c   :  { %v2920_v18 = vpop.f32.mrf.mxu0  ;;  %v3167_v13 = vpop.f32.mrf.mxu1 }
 0x22d   :  { %v3168_v54 = vadd.f32 %v3167_v13, %v5963_v2  ;;  %v3424_v40 = vmax.f32 %v3176_v24, 0.0 }
 0x22e   :  { %v2921_v19 = vpop.f32.mrf.mxu0  ;;  %v4052_v25 = vpop.f32.mrf.mxu1 }
 0x22f   :  { %v2922_v21 = vadd.f32 %v2921_v19, %v5450_v61  ;;  %v3179_v51 = vadd.f32 %v4052_v25, %v5990_v17  ;;  %v3422_v14 = vmax.f32 %v3168_v54, 0.0 }
 0x230   :  { %v2923_v11 = vpop.f32.mrf.mxu0  ;;  %v3170_v29 = vpop.f32.mrf.mxu1 }
 0x231   :  { %v3425_v3 = vmax.f32 %v3179_v51, 0.0  ;;  %v3171_v33 = vadd.f32 %v3170_v29, %v5972_v45 }
 0x232   :  { %v2926_v35 = vpop.f32.mrf.mxu0  ;;  %v4055_v48 = vpop.f32.mrf.mxu1 }
 0x233   :  { %v2927_v34 = vadd.f32 %v2926_v35, %v5455_v7  ;;  %v6043_v18 = vpack.c.bf16 %v3425_v3, %v3424_v40  ;;  %v3423_v2 = vmax.f32 %v3171_v33, 0.0  ;;  %v3192_v13 = vadd.f32 %v4055_v48, %v2903_v6 }
 0x234   :  { %v2928_v26 = vpop.f32.mrf.mxu0  ;;  %v3183_v61 = vpop.f32.mrf.mxu1 }
 0x235   :  { %v6045_v19 = vpack.c.bf16 %v3423_v2, %v3422_v14  ;;  %v3184_v17 = vadd.f32 %v3183_v61, %v5996_v23  ;;  %v3428_v7 = vmax.f32 %v3192_v13, 0.0 }
 0x236   :  { %v2929_v25 = vpop.f32.mrf.mxu0  ;;  %v4056_v51 = vpop.f32.mrf.mxu1 }
 0x237   :  { %v2930_v24 = vadd.f32 %v2929_v25, %v5474_v31  ;;  %v3195_v45 = vadd.f32 %v4056_v51, %v2906_v20  ;;  %v3426_v6 = vmax.f32 %v3184_v17, 0.0 }
 0x238   :  { %v2931_v11 = vpop.f32.mrf.mxu0  ;;  %v3186_v29 = vpop.f32.mrf.mxu1 }
 0x239   :  { %v3429_v35 = vmax.f32 %v3195_v45, 0.0  ;;  %v3187_v54 = vadd.f32 %v3186_v29, %v6002_v62 }
 0x23a   :  { %v2934_v40 = vpop.f32.mrf.mxu0  ;;  %v4059_v26 = vpop.f32.mrf.mxu1 }
 0x23b   :  { %v2935_v33 = vadd.f32 %v2934_v40, %v5479_v4  ;;  %v6051_v3 = vpack.c.bf16 %v3429_v35, %v3428_v7  ;;  %v3427_v48 = vmax.f32 %v3187_v54, 0.0  ;;  %v3208_v23 = vadd.f32 %v4059_v26, %v2919_v58  ;;  %v6273_v7 = vld [vmem:[#allocation2_spill] sm:$0xff] }
 0x23c   :  { %v2936_v14 = vpop.f32.mrf.mxu0  ;;  %v3199_v2 = vpop.f32.mrf.mxu1 }
 0x23d   :  { %v6053_v31 = vpack.c.bf16 %v3427_v48, %v3426_v6  ;;  %v3200_v20 = vadd.f32 %v3199_v2, %v2911_v60  ;;  %v3432_v11 = vmax.f32 %v3208_v23, 0.0  ;;  %v6274_v2 = vld [vmem:[#allocation3_spill] sm:$0xff] }
 0x23e   :  { %v2937_v61 = vpop.f32.mrf.mxu0  ;;  %v4060_v25 = vpop.f32.mrf.mxu1 }
 0x23f   :  { %v2938_v13 = vadd.f32 %v2937_v61, %v5496_v15  ;;  %v3211_v51 = vadd.f32 %v4060_v25, %v2922_v21  ;;  %v3430_v58 = vmax.f32 %v3200_v20, 0.0 }
 0x240   :  { %v2939_v62 = vpop.f32.mrf.mxu0  ;;  %v3202_v45 = vpop.f32.mrf.mxu1 }
 0x241   :  { %v3433_v4 = vmax.f32 %v3211_v51, 0.0  ;;  %v3203_v29 = vadd.f32 %v3202_v45, %v2914_v22 }
 0x242   :  { %v2942_v17 = vpop.f32.mrf.mxu0  ;;  %v4063_v54 = vpop.f32.mrf.mxu1 }
 0x243   :  { %v2943_v35 = vadd.f32 %v2942_v17, %v6273_v7  ;;  %v6057_v40 = vpack.c.bf16 %v3433_v4, %v3432_v11  ;;  %v3431_v26 = vmax.f32 %v3203_v29, 0.0  ;;  %v3224_v15 = vadd.f32 %v4063_v54, %v2935_v33  ;;  %v6275_v11 = vld [vmem:[#allocation4_spill] sm:$0xff] }
 0x244   :  { %v2944_v6 = vpop.f32.mrf.mxu0  ;;  %v3215_v60 = vpop.f32.mrf.mxu1 }
 0x245   :  { %v6059_v48 = vpack.c.bf16 %v3431_v26, %v3430_v58  ;;  %v3216_v14 = vadd.f32 %v3215_v60, %v2927_v34  ;;  %v3436_v62 = vmax.f32 %v3224_v15, 0.0 }
 0x246   :  { %v2945_v21 = vpop.f32.mrf.mxu0  ;;  %v4064_v23 = vpop.f32.mrf.mxu1 }
 0x247   :  { %v2946_v61 = vadd.f32 %v2945_v21, %v6274_v2  ;;  %v3227_v25 = vadd.f32 %v4064_v23, %v2938_v13  ;;  %v3434_v7 = vmax.f32 %v3216_v14, 0.0  ;;  %v6276_v21 = vld [vmem:[#allocation5_spill] sm:$0xff] }
 0x248   :  { %v2947_v22 = vpop.f32.mrf.mxu0  ;;  %v3218_v51 = vpop.f32.mrf.mxu1 }
 0x249   :  { %v3437_v45 = vmax.f32 %v3227_v25, 0.0  ;;  %v3219_v17 = vadd.f32 %v3218_v51, %v2930_v24 }
 0x24a   :  { %v2950_v20 = vpop.f32.mrf.mxu0  ;;  %v4067_v29 = vpop.f32.mrf.mxu1 }
 0x24b   :  { %v2951_v4 = vadd.f32 %v2950_v20, %v6275_v11  ;;  %v6063_v6 = vpack.c.bf16 %v3437_v45, %v3436_v62  ;;  %v3435_v58 = vmax.f32 %v3219_v17, 0.0  ;;  %v6277_v11 = vld [vmem:[#allocation6_spill] sm:$0xff] }
 0x24c   :  { %v2952_v33 = vpop.f32.mrf.mxu0  ;;  %v3231_v54 = vpop.f32.mrf.mxu1 }
 0x24d   :  { %v3240_v34 = vadd.f32 %v4067_v29, %v2951_v4  ;;  %v6065_v26 = vpack.c.bf16 %v3435_v58, %v3434_v7  ;;  %v3232_v60 = vadd.f32 %v3231_v54, %v2943_v35  ;;  %v6278_v54 = vld [vmem:[#allocation7_spill] sm:$0xff] }
 0x24e   :  { %v2953_v13 = vpop.f32.mrf.mxu0  ;;  %v4068_v15 = vpop.f32.mrf.mxu1 }
 0x24f   :  { %v2954_v2 = vadd.f32 %v2953_v13, %v6276_v21  ;;  %v3440_v20 = vmax.f32 %v3240_v34, 0.0  ;;  %v3438_v45 = vmax.f32 %v3232_v60, 0.0 }
 0x250   :  { %v2955_v23 = vpop.f32.mrf.mxu0  ;;  %v3234_v25 = vpop.f32.mrf.mxu1 }
 0x251   :  { %v3243_v24 = vadd.f32 %v4068_v15, %v2954_v2  ;;  %v3235_v22 = vadd.f32 %v3234_v25, %v2946_v61 }
 0x252   :  { %v2958_v51 = vpop.f32.mrf.mxu0  ;;  %v4071_v62 = vpop.f32.mrf.mxu1 }
 0x253   :  { %v3441_v14 = vmax.f32 %v3243_v24, 0.0  ;;  %v3439_v17 = vmax.f32 %v3235_v22, 0.0  ;;  %v2959_v4 = vadd.f32 %v2958_v51, %v6277_v11  ;;  %v6279_v24 = vld [vmem:[#allocation8_spill] sm:$0xff] }
 0x254   :  { %v2960_v29 = vpop.f32.mrf.mxu0  ;;  %v3247_v35 = vpop.f32.mrf.mxu1 }
 0x255   :  { %v6069_v7 = vpack.c.bf16 %v3441_v14, %v3440_v20  ;;  %v6071_v58 = vpack.c.bf16 %v3439_v17, %v3438_v45  ;;  %v3248_v2 = vadd.f32 %v3247_v35, %v2959_v4  ;;  %v6280_v29 = vld [vmem:[#allocation9_spill] sm:$0xff] }
 0x256   :  { %v2961_v33 = vpop.f32.mrf.mxu0  ;;  %v4072_v21 = vpop.f32.mrf.mxu1 }
 0x257   :  { %v2962_v13 = vadd.f32 %v2961_v33, %v6278_v54  ;;  %v3442_v22 = vmax.f32 %v3248_v2, 0.0 }
 0x258   :  { %v2963_v61 = vpop.f32.mrf.mxu0  ;;  %v3250_v15 = vpop.f32.mrf.mxu1 }
 0x259   :  { %v3251_v34 = vadd.f32 %v3250_v15, %v2962_v13 }
 0x25a   :  { %v2966_v23 = vpop.f32.mrf.mxu0  ;;  %v4075_v25 = vpop.f32.mrf.mxu1 }
 0x25b   :  { %v2967_v60 = vadd.f32 %v2966_v23, %v6279_v24  ;;  %v3443_v51 = vmax.f32 %v3251_v34, 0.0 }
 0x25c   :  { %v2968_v11 = vpop.f32.mrf.mxu0  ;;  %v3263_v20 = vpop.f32.mrf.mxu1 }
 0x25d   :  { %v6075_v14 = vpack.c.bf16 %v3443_v51, %v3442_v22  ;;  %v3256_v17 = vadd.f32 %v4071_v62, %v2967_v60 }
 0x25e   :  { %v2969_v45 = vpop.f32.mrf.mxu0  ;;  %v4076_v33 = vpop.f32.mrf.mxu1 }
 0x25f   :  { %v2970_v37 = vadd.f32 %v2969_v45, %v6280_v29  ;;  %v3444_v13 = vmax.f32 %v3256_v17, 0.0  ;;  %v6283_v17 = vld [vmem:[#allocation12_spill] sm:$0xff] }
 0x260   :  { %v2971_v54 = vpop.f32.mrf.mxu0  ;;  %v3266_v35 = vpop.f32.mrf.mxu1 }
 0x261   :  { %v3259_v4 = vadd.f32 %v4072_v21, %v2970_v37 }
 0x262   :  { %v2974_v61 = vpop.f32.mrf.mxu0  ;;  %v4079_v24 = vpop.f32.mrf.mxu1 }
 0x263   :  { %v3445_v15 = vmax.f32 %v3259_v4, 0.0  ;;  %v2975_v23 = vadd.f32 %v2974_v61, %v6281_v49 }
 0x264   :  { %v2976_v2 = vpop.f32.mrf.mxu0  ;;  %v3279_v34 = vpop.f32.mrf.mxu1 }
 0x265   :  { %v6079_v11 = vpack.c.bf16 %v3445_v15, %v3444_v13  ;;  %v3264_v51 = vadd.f32 %v3263_v20, %v2975_v23  ;;  %v6284_v20 = vld [vmem:[#allocation13_spill] sm:$0xff] }
 0x266   :  { %v2977_v22 = vpop.f32.mrf.mxu0  ;;  %v4080_v60 = vpop.f32.mrf.mxu1 }
 0x267   :  { %v2978_v62 = vadd.f32 %v2977_v22, %v6282_v27  ;;  %v3446_v21 = vmax.f32 %v3264_v51, 0.0 }
 0x268   :  { %v2979_v45 = vpop.f32.mrf.mxu0  ;;  %v3282_v54 = vpop.f32.mrf.mxu1 }
 0x269   :  { %v3267_v29 = vadd.f32 %v3266_v35, %v2978_v62 }
 0x26a   :  { %v2982_v37 = vpop.f32.mrf.mxu0  ;;  %v6083_v55 = vpop.f32.mrf.mxu1 }
 0x26b   :  { %v3447_v50 = vmax.f32 %v3267_v29, 0.0  ;;  %v2983_v4 = vadd.f32 %v2982_v37, %v6283_v17 }
 0x26c   :  { %v2984_v49 = vpop.f32.mrf.mxu0  ;;  %v3295_v61 = vpop.f32.mrf.mxu1 }
 0x26d   :  { %v6085_v2 = vpack.c.bf16 %v3447_v50, %v3446_v21  ;;  %v3272_v15 = vadd.f32 %v4075_v25, %v2983_v4  ;;  %v6286_v4 = vld [vmem:[#allocation15_spill] sm:$0xff] }
 0x26e   :  { %v2985_v13 = vpop.f32.mrf.mxu0  ;;  %v6088_v27 = vpop.f32.mrf.mxu1 }
 0x26f   :  { %v2986_v23 = vadd.f32 %v2985_v13, %v6284_v20  ;;  %v3448_v51 = vmax.f32 %v3272_v15, 0.0 }
 0x270   :  { %v2987_v22 = vpop.f32.mrf.mxu0  ;;  %v3298_v62 = vpop.f32.mrf.mxu1 }
 0x271   :  { %v3275_v35 = vadd.f32 %v4076_v33, %v2986_v23 }
 0x272   :  { %v2990_v45 = vpop.f32.mrf.mxu0  ;;  %v6091_v17 = vpop.f32.mrf.mxu1 }
 0x273   :  { %v3449_v29 = vmax.f32 %v3275_v35, 0.0  ;;  %v2991_v37 = vadd.f32 %v2990_v45, %v6285_v10  ;;  %v6287_v10 = vld [vmem:[#allocation16_spill] sm:$0xff] }
 0x274   :  { %v2992_v49 = vpop.f32.mrf.mxu0  ;;  %v6093_v44 = vpop.f32.mrf.mxu1 }
 0x275   :  { %v3500_v50 = vpack.c.bf16 %v3449_v29, %v3448_v51  ;;  %v3280_v25 = vadd.f32 %v3279_v34, %v2991_v37 }
 0x276   :  { %v2993_v21 = vpop.f32.mrf.mxu0  ;;  %v6096_v20 = vpop.f32.mrf.mxu1 }
 0x277   :  { %v2994_v13 = vadd.f32 %v2993_v21, %v6286_v4  ;;  %v3450_v35 = vmax.f32 %v3280_v25, 0.0 }
 0x278   :  { %v2995_v22 = vpop.f32.mrf.mxu0  ;;  %v6098_v23 = vpop.f32.mrf.mxu1 }
 0x279   :  { %v3283_v33 = vadd.f32 %v3282_v54, %v2994_v13 }
 0x27a   :  { %v2998_v15 = vpop.f32.mrf.mxu0  ;;  %v6101_v0 = vpop.f32.mrf.mxu1 }
 0x27b   :  { %v3451_v46 = vmax.f32 %v3283_v33, 0.0  ;;  %v2999_v45 = vadd.f32 %v2998_v15, %v6287_v10  ;;  %6288 = vst [vmem:[#allocation2_spill] sm:$0xff] %v6101_v0  ;;  %v6289_v15 = vld [vmem:[#allocation17_spill] sm:$0xff] }
 0x27c   :  { %v3000_v49 = vpop.f32.mrf.mxu0  ;;  %v6103_v53 = vpop.f32.mrf.mxu1 }
 0x27d   :  { %v3501_v51 = vpack.c.bf16 %v3451_v46, %v3450_v35  ;;  %v3288_v29 = vadd.f32 %v4079_v24, %v2999_v45 }
 0x27e   :  { %v3001_v34 = vpop.f32.mrf.mxu0  ;;  %v6106_v21 = vpop.f32.mrf.mxu1 }
 0x27f   :  { %v3002_v37 = vadd.f32 %v3001_v34, %v5703_v8  ;;  %v3452_v22 = vmax.f32 %v3288_v29, 0.0 }
 0x280   :  { %v3003_v54 = vpop.f32.mrf.mxu0  ;;  %v6108_v13 = vpop.f32.mrf.mxu1 }
 0x281   :  { %v3291_v4 = vadd.f32 %v4080_v60, %v3002_v37 }
 0x282   :  { %v3006_v25 = vpop.f32.mrf.mxu0  ;;  %v6111_v0 = vpop.f32.mrf.mxu1 }
 0x283   :  { %v3453_v33 = vmax.f32 %v3291_v4, 0.0  ;;  %v3007_v10 = vadd.f32 %v3006_v25, %v6289_v15 }
 0x284   :  { %v3008_v49 = vpop.f32.mrf.mxu0  ;;  %v6113_v46 = vpop.f32.mrf.mxu1 }
 0x285   :  { %v3296_v42 = vadd.f32 %v3295_v61, %v3007_v10  ;;  %v3502_v24 = vpack.c.bf16 %v3453_v33, %v3452_v22 }
 0x286   :  { %v3009_v35 = vpop.f32.mrf.mxu0  ;;  %v6116_v45 = vpop.f32.mrf.mxu1 }
 0x287   :  { %v3010_v8 = vadd.f32 %v3009_v35, %v5719_v9  ;;  %3989 = vmatprep.subr.bf16.mxu1 %v3502_v24  ;;  %v3454_v54 = vmax.f32 %v3296_v42, 0.0 }
 0x288   :  { %v3011_v60 = vpop.f32.mrf.mxu0  ;;  %3990 = vmatpush3.bf16.msra.mxu1 %v6063_v6  ;;  %v6119_v29 = vpop.f32.mrf.mxu1 }
 0x289   :  { %v3299_v34 = vadd.f32 %v3298_v62, %v3010_v8  ;;  %3991 = vmatprep.subr.bf16.mxu1 %v3501_v51 }
 0x28a   :  { %v3014_v37 = vpop.f32.mrf.mxu0  ;;  %v6122_v25 = vpop.f32.mrf.mxu1 }
 0x28b   :  { %v3455_v4 = vmax.f32 %v3299_v34, 0.0  ;;  %v3015_v61 = vadd.f32 %v3014_v37, %v5721_v52 }
 0x28c   :  { %v3016_v22 = vpop.f32.mrf.mxu0  ;;  %3992 = vmatpush3.bf16.msra.mxu1 %v6065_v26  ;;  %v6128_v15 = vpop.f32.mrf.mxu1 }
 0x28d   :  { %v6125_v9 = vpack.c.bf16 %v3455_v4, %v3454_v54  ;;  %v3304_v33 = vadd.f32 %v6083_v55, %v3015_v61  ;;  %3993 = vmatprep.subr.bf16.mxu1 %v3500_v50 }
 0x28e   :  { %v3017_v6 = vpop.f32.mrf.mxu0  ;;  %v6131_v51 = vpop.f32.mrf.mxu1 }
 0x28f   :  { %v3018_v62 = vadd.f32 %v3017_v6, %v5735_v39  ;;  %v3456_v49 = vmax.f32 %v3304_v33, 0.0 }
 0x290   :  { %v3019_v42 = vpop.f32.mrf.mxu0  ;;  %3994 = vmatpush3.bf16.msra.mxu1 %v6057_v40  ;;  %v6135_v10 = vpop.f32.mrf.mxu1 }
 0x291   :  { %v3307_v52 = vadd.f32 %v6088_v27, %v3018_v62  ;;  %3995 = vmatprep.subr.bf16.mxu1 %v6085_v2 }
 0x292   :  { %v3022_v26 = vpop.f32.mrf.mxu0  ;;  %v4103_v50 = vpop.f32.mrf.mxu1 }
 0x293   :  { %v3457_v55 = vmax.f32 %v3307_v52, 0.0  ;;  %v3023_v24 = vadd.f32 %v3022_v26, %v5738_v56  ;;  %v3384_v27 = vadd.f32 %v4103_v50, %v5966_v63 }
 0x294   :  { %v3024_v35 = vpop.f32.mrf.mxu0  ;;  %3996 = vmatpush3.bf16.msra.mxu1 %v6059_v48  ;;  %v6143_v40 = vpop.f32.mrf.mxu1 }
 0x295   :  { %v6140_v39 = vpack.c.bf16 %v3457_v55, %v3456_v49  ;;  %v3312_v8 = vadd.f32 %v6093_v44, %v3023_v24  ;;  %3997 = vmatprep.subr.bf16.mxu1 %v6079_v11  ;;  %v3476_v44 = vmax.f32 %v3384_v27, 0.0 }
 0x296   :  { %v3025_v2 = vpop.f32.mrf.mxu0  ;;  %v4104_v34 = vpop.f32.mrf.mxu1 }
 0x297   :  { %v3026_v60 = vadd.f32 %v3025_v2, %v5753_v12  ;;  %v3387_v56 = vadd.f32 %v4104_v34, %v5978_v41  ;;  %v3458_v61 = vmax.f32 %v3312_v8, 0.0 }
 0x298   :  { %v3027_v37 = vpop.f32.mrf.mxu0  ;;  %3998 = vmatpush3.bf16.msra.mxu1 %v6051_v3  ;;  %v6151_v54 = vpop.f32.mrf.mxu1  ;;  %v3526_v3 = vcombine.high %v6020_v59, %v6020_v59 }
 0x299   :  { %v3315_v48 = vadd.f32 %v6098_v23, %v3026_v60  ;;  %3999 = vmatprep.subr.bf16.mxu1 %v6075_v14  ;;  %v3477_v4 = vmax.f32 %v3387_v56, 0.0 }
 0x29a   :  { %v3030_v11 = vpop.f32.mrf.mxu0  ;;  %v4107_v12 = vpop.f32.mrf.mxu1  ;;  %v6170_v59 = vrot.slane %v3526_v3, %v6015_v36 }
 0x29b   :  { %v3459_v63 = vmax.f32 %v3315_v48, 0.0  ;;  %v3031_v22 = vadd.f32 %v3030_v11, %v5756_v5  ;;  %v6155_v33 = vpack.c.bf16 %v3477_v4, %v3476_v44  ;;  %v3400_v62 = vadd.f32 %v4107_v12, %v5999_v43  ;;  %v6290_v48 = vld [vmem:[#allocation30_spill] sm:$0xff]  ;;  %v6291_v44 = vld [vmem:[#allocation32_spill] sm:$0xff]  ;;  %v6292_v12 = vld [vmem:[#allocation31_spill] sm:$0xff] }
 0x29c   :  { %v3032_v41 = vpop.f32.mrf.mxu0  ;;  %4000 = vmatpush3.bf16.msra.mxu1 %v6053_v31  ;;  %v3391_v6 = vpop.f32.mrf.mxu1 }
 0x29d   :  { %v6160_v23 = vpack.c.bf16 %v3459_v63, %v3458_v61  ;;  %v3320_v14 = vadd.f32 %v6091_v17, %v3031_v22  ;;  %4001 = vmatprep.subr.bf16.mxu1 %v6069_v7  ;;  %v3392_v26 = vadd.f32 %v3391_v6, %v5984_v28  ;;  %v3480_v43 = vmax.f32 %v3400_v62, 0.0 }
 0x29e   :  { %v3033_v42 = vpop.f32.mrf.mxu0  ;;  %v4108_v52 = vpop.f32.mrf.mxu1 }
 0x29f   :  { %v3034_v5 = vadd.f32 %v3033_v42, %v5771_v38  ;;  %v3403_v31 = vadd.f32 %v4108_v52, %v6005_v30  ;;  %v3460_v50 = vmax.f32 %v3320_v14, 0.0  ;;  %v3478_v8 = vmax.f32 %v3392_v26, 0.0  ;;  %v6294_v26 = vld [vmem:[#allocation2_spill] sm:$0xff] }
 0x2a0   :  { %v3035_v49 = vpop.f32.mrf.mxu0  ;;  %4002 = vmatpush3.bf16.msra.mxu1 %v6043_v18  ;;  %v3394_v55 = vpop.f32.mrf.mxu1 }
 0x2a1   :  { %v3323_v17 = vadd.f32 %v6096_v20, %v3034_v5  ;;  %4003 = vmatprep.subr.bf16.mxu1 %v6071_v58  ;;  %v3481_v7 = vmax.f32 %v3403_v31, 0.0  ;;  %v3395_v38 = vadd.f32 %v3394_v55, %v5993_v32  ;;  %v3542_v58 = vcombine.high %v6170_v59, %v6170_v59 }
 0x2a2   :  { %v3038_v24 = vpop.f32.mrf.mxu0  ;;  %v4111_v35 = vpop.f32.mrf.mxu1 }
 0x2a3   :  { %v3461_v28 = vmax.f32 %v3323_v17, 0.0  ;;  %v3039_v30 = vadd.f32 %v3038_v24, %v5774_v57  ;;  %v6176_v18 = vpack.c.bf16 %v3481_v7, %v3480_v43  ;;  %v3479_v36 = vmax.f32 %v3395_v38, 0.0  ;;  %v6295_v17 = vld [vmem:[#allocation19_spill] sm:$0xff] }
 0x2a4   :  { %v3040_v27 = vpop.f32.mrf.mxu0  ;;  %4004 = vmatpush3.bf16.msra.mxu1 %v6045_v19  ;;  %v3407_v2 = vpop.f32.mrf.mxu1  ;;  %v3416_v57 = vadd.f32 %v4111_v35, %v6028_v1 }
 0x2a5   :  { %v6181_v20 = vpack.c.bf16 %v3461_v28, %v3460_v50  ;;  %v3328_v32 = vadd.f32 %v6103_v53, %v3039_v30  ;;  %v6184_v60 = vpack.c.bf16 %v3479_v36, %v3478_v8  ;;  %v3408_v19 = vadd.f32 %v3407_v2, %v6290_v48  ;;  %v6296_v28 = vld [vmem:[#allocation20_spill] sm:$0xff]  ;;  %v6298_v48 = vld [vmem:[#allocation22_spill] sm:$0xff] }
 0x2a6   :  { %v3041_v34 = vpop.f32.mrf.mxu0  ;;  %v4112_v37 = vpop.f32.mrf.mxu1  ;;  %v3484_v63 = vmax.f32 %v3416_v57, 0.0 }
 0x2a7   :  { %v3042_v56 = vadd.f32 %v3041_v34, %v5789_v16  ;;  %3580 = vmatmul.mubr.bf16.vlgmr.msra.gmra.mxu1 %v6025_v47  ;;  %v3419_v4 = vadd.f32 %v4112_v37, %v6291_v44  ;;  %v3462_v3 = vmax.f32 %v3328_v32, 0.0  ;;  %v6293_v16 = vld [vmem:[#allocation18_spill] sm:$0xff]  ;;  %v3482_v62 = vmax.f32 %v3408_v19, 0.0 }
 0x2a8   :  { %v3043_v11 = vpop.f32.mrf.mxu0  ;;  %3619 = vmatprep.mubr.bf16.mxu1 %v3542_v58  ;;  %v3410_v53 = vpop.f32.mrf.mxu1  ;;  %v6297_v58 = vld [vmem:[#allocation21_spill] sm:$0xff] }
 0x2a9   :  { %v3331_v61 = vadd.f32 %v6108_v13, %v3042_v56  ;;  %v3485_v22 = vmax.f32 %v3419_v4, 0.0  ;;  %v3411_v41 = vadd.f32 %v3410_v53, %v6292_v12 }
 0x2aa   :  { %v3046_v1 = vpop.f32.mrf.mxu0 }
 0x2ab   :  { %v3463_v14 = vmax.f32 %v3331_v61, 0.0  ;;  %v3047_v6 = vadd.f32 %v3046_v1, %v6293_v16  ;;  %v3518_v47 = vpack.c.bf16 %v3485_v22, %v3484_v63  ;;  %v3483_v42 = vmax.f32 %v3411_v41, 0.0  ;;  %v6299_v61 = vld [vmem:[#allocation23_spill] sm:$0xff]  ;;  %v6300_v1 = vld [vmem:[#allocation24_spill] sm:$0xff] }
 0x2ac   :  { %v3048_v5 = vpop.f32.mrf.mxu0 }
 0x2ad   :  { %v3507_v52 = vpack.c.bf16 %v3463_v14, %v3462_v3  ;;  %v3336_v31 = vadd.f32 %v6294_v26, %v3047_v6  ;;  %v3517_v49 = vpack.c.bf16 %v3483_v42, %v3482_v62  ;;  %4011 = vmatprep.subr.bf16.mxu1 %v3518_v47  ;;  %v6301_v62 = vld [vmem:[#allocation25_spill] sm:$0xff] }
 0x2ae   :  { %v3049_v13 = vpop.f32.mrf.mxu0 }
 0x2af   :  { %v3050_v55 = vadd.f32 %v3049_v13, %v6295_v17  ;;  %v3464_v24 = vmax.f32 %v3336_v31, 0.0  ;;  %v6302_v31 = vld [vmem:[#allocation26_spill] sm:$0xff] }
 0x2b0   :  { %v3051_v43 = vpop.f32.mrf.mxu0 }
 0x2b1   :  { %v3339_v7 = vadd.f32 %v6106_v21, %v3050_v55 }
 0x2b2   :  { %v3054_v38 = vpop.f32.mrf.mxu0 }
 0x2b3   :  { %v3465_v50 = vmax.f32 %v3339_v7, 0.0  ;;  %v3055_v30 = vadd.f32 %v3054_v38, %v6296_v28  ;;  %v6303_v7 = vld [vmem:[#allocation27_spill] sm:$0xff] }
 0x2b4   :  { %v3056_v35 = vpop.f32.mrf.mxu0 }
 0x2b5   :  { %v3508_v8 = vpack.c.bf16 %v3465_v50, %v3464_v24  ;;  %v3344_v27 = vadd.f32 %v6113_v46, %v3055_v30  ;;  %v6304_v30 = vld [vmem:[#allocation28_spill] sm:$0xff] }
 0x2b6   :  { %v3057_v36 = vpop.f32.mrf.mxu0 }
 0x2b7   :  { %v3058_v32 = vadd.f32 %v3057_v36, %v6297_v58  ;;  %v3466_v56 = vmax.f32 %v3344_v27, 0.0  ;;  %v6305_v58 = vld [vmem:[#allocation29_spill] sm:$0xff] }
 0x2b8   :  { %v3059_v2 = vpop.f32.mrf.mxu0 }
 0x2b9   :  { %v3347_v57 = vadd.f32 %v6119_v29, %v3058_v32 }
 0x2ba   :  { %v3062_v34 = vpop.f32.mrf.mxu0 }
 0x2bb   :  { %v3467_v37 = vmax.f32 %v3347_v57, 0.0  ;;  %v3063_v21 = vadd.f32 %v3062_v34, %v6298_v48 }
 0x2bc   :  { %v3064_v19 = vpop.f32.mrf.mxu0 }
 0x2bd   :  { %v3509_v44 = vpack.c.bf16 %v3467_v37, %v3466_v56  ;;  %v3352_v11 = vadd.f32 %v6111_v0, %v3063_v21  ;;  %v3523_v56 = vpop.permute.xlu0 %3522 }
 0x2be   :  { %v3065_v4 = vpop.f32.mrf.mxu0 }
 0x2bf   :  { %v3066_v53 = vadd.f32 %v3065_v4, %v6299_v61  ;;  %v3468_v12 = vmax.f32 %v3352_v11, 0.0 }
 0x2c0   :  { %v3067_v63 = vpop.f32.mrf.mxu0 }
 0x2c1   :  { %v3355_v46 = vadd.f32 %v6116_v45, %v3066_v53 }
 0x2c2   :  { %v3070_v22 = vpop.f32.mrf.mxu0 }
 0x2c3   :  { %v3469_v41 = vmax.f32 %v3355_v46, 0.0  ;;  %v3071_v29 = vadd.f32 %v3070_v22, %v6300_v1 }
 0x2c4   :  { %v3072_v3 = vpop.f32.mrf.mxu0 }
 0x2c5   :  { %v3510_v14 = vpack.c.bf16 %v3469_v41, %v3468_v12  ;;  %v3360_v16 = vadd.f32 %v6128_v15, %v3071_v29 }
 0x2c6   :  { %v3073_v6 = vpop.f32.mrf.mxu0 }
 0x2c7   :  { %v3074_v47 = vadd.f32 %v3073_v6, %v6301_v62  ;;  %4012 = vmatpush3.bf16.msra.mxu1 %v3510_v14  ;;  %v3470_v26 = vmax.f32 %v3360_v16, 0.0 }
 0x2c8   :  { %v3075_v42 = vpop.f32.mrf.mxu0  ;;  %4013 = vmatprep.subr.bf16.mxu1 %v3517_v49 }
 0x2c9   :  { %v3363_v0 = vadd.f32 %v6135_v10, %v3074_v47 }
 0x2ca   :  { %v3078_v5 = vpop.f32.mrf.mxu0 }
 0x2cb   :  { %v3471_v45 = vmax.f32 %v3363_v0, 0.0  ;;  %v3079_v13 = vadd.f32 %v3078_v5, %v6302_v31  ;;  %4014 = vmatpush3.bf16.msra.mxu1 %v3509_v44 }
 0x2cc   :  { %v3080_v17 = vpop.f32.mrf.mxu0  ;;  %4015 = vmatprep.subr.bf16.mxu1 %v6176_v18 }
 0x2cd   :  { %v3368_v55 = vadd.f32 %v6122_v25, %v3079_v13  ;;  %v3511_v15 = vpack.c.bf16 %v3471_v45, %v3470_v26 }
 0x2ce   :  { %v3081_v43 = vpop.f32.mrf.mxu0 }
 0x2cf   :  { %v3082_v38 = vadd.f32 %v3081_v43, %v6303_v7  ;;  %4016 = vmatpush3.bf16.msra.mxu1 %v3508_v8  ;;  %v3472_v50 = vmax.f32 %v3368_v55, 0.0 }
 0x2d0   :  { %v3083_v24 = vpop.f32.mrf.mxu0  ;;  %4017 = vmatprep.subr.bf16.mxu1 %v6184_v60 }
 0x2d1   :  { %v3371_v10 = vadd.f32 %v6131_v51, %v3082_v38 }
 0x2d2   :  { %v3086_v49 = vpop.f32.mrf.mxu0 }
 0x2d3   :  { %v3473_v28 = vmax.f32 %v3371_v10, 0.0  ;;  %v3087_v35 = vadd.f32 %v3086_v49, %v6304_v30  ;;  %4018 = vmatpush3.bf16.msra.mxu1 %v3507_v52 }
 0x2d4   :  { %v3088_v36 = vpop.f32.mrf.mxu0  ;;  %4019 = vmatprep.subr.bf16.mxu1 %v6155_v33 }
 0x2d5   :  { %v3376_v25 = vadd.f32 %v6143_v40, %v3087_v35  ;;  %v3512_v18 = vpack.c.bf16 %v3473_v28, %v3472_v50 }
 0x2d6   :  { %v3089_v27 = vpop.f32.mrf.mxu0 }
 0x2d7   :  { %v3090_v8 = vadd.f32 %v3089_v27, %v6305_v58  ;;  %4020 = vmatpush3.bf16.msra.mxu1 %v6181_v20  ;;  %v3474_v32 = vmax.f32 %v3376_v25, 0.0 }
 0x2d8   :  { %v3091_v60 = vpop.f32.mrf.mxu0 }
 0x2d9   :  { %v3379_v51 = vadd.f32 %v6151_v54, %v3090_v8 }
 0x2db   :  { %v3475_v2 = vmax.f32 %v3379_v51, 0.0 }
 0x2dd   :  { %v3513_v57 = vpack.c.bf16 %v3475_v2, %v3474_v32 }
 0x2df   :  { %4021 = vmatprep.subr.bf16.mxu1 %v3513_v57 }
 0x2e0   :  { %4022 = vmatpush3.bf16.msra.mxu1 %v6160_v23 }
 0x2e1   :  { %4023 = vmatprep.subr.bf16.mxu1 %v3512_v18 }
 0x2e4   :  { %4024 = vmatpush3.bf16.msra.mxu1 %v6140_v39 }
 0x2e5   :  { %4025 = vmatprep.subr.bf16.mxu1 %v3511_v15 }
 0x2e8   :  { %4026 = vmatpush3.bf16.msra.mxu1 %v6125_v9  ;;  %v3629_v9 = vld [vmem:[%s6239_s5] sm:$0x3] }
 0x2e9   :  { %v3631_v39 = vrot.slane %v3629_v9, 6 }
 0x2eb   :  { %3620 = vmatmul.mubr.bf16.vlgmr.msra.gmra.mxu1 %v6170_v59 }
 0x367   :  { %v4005_v40 = vpop.f32.mrf.mxu1 }
 0x369   :  { %v4006_v33 = vpop.f32.mrf.mxu1 }
 0x36a   :  { %v4007_v20 = vadd.f32 %v4006_v33, %v4005_v40 }
 0x36b   :  { %v4008_v52 = vpop.f32.mrf.mxu1 }
 0x36c   :  { %v3582_v48 = vadd.f32 %v4007_v20, %v3523_v56 }
 0x36d   :  { %v4009_v34 = vpop.f32.mrf.mxu1 }
 0x3ab   :  { %v4027_v54 = vpop.f32.mrf.mxu1 }
 0x3ad   :  { %v4028_v37 = vpop.f32.mrf.mxu1 }
 0x3ae   :  { %v4029_v21 = vadd.f32 %v4028_v37, %v4027_v54 }
 0x3af   :  { %v4030_v19 = vpop.f32.mrf.mxu1 }
 0x3b0   :  { %v3622_v23 = vadd.f32 %v4029_v21, %v3582_v48 }
 0x3b1   :  { %v4031_v44 = vpop.f32.mrf.mxu1 }
 0x3b2   :  { %v3627_v4 = vmul.f32 1.442695, %v3622_v23  ;;  %v3641_v59 = vmul.f32 %v3622_v23, %v3622_v23 }
 0x3b4   :  { %4526 = vpow2.f32 %v3627_v4  ;;  %v3643_v63 = vrot.slane %v3641_v59, 6 }
 0x3c1   :  { %v4527_v11 = vpop.eup %4526 }
 0x3c2   :  { %v3633_v61 = vmul.f32 %v4527_v11, %v3631_v39  ;;  %v3640_v53 = vmul.f32 %v4527_v11, %v4527_v11 }
 0x3c4   :  { %v3635_v46 = vrot.slane %v3633_v61, 2  ;;  %v3645_v22 = vadd.f32 %v3643_v63, %v3640_v53 }
 0x3c6   :  { %v3637_v12 = vadd.f32 %v3635_v46, %v3622_v23  ;;  %v3646_v41 = vsub.f32 %v3645_v22, %v3622_v23 }
 0x3c8   :  { %3639 = vst.msk [vmem:[%s6240_s6] sm:$0x3] %vm3638_vm0, %v3637_v12  ;;  %v3948_v1 = vadd.f32 -0.5, %v3646_v41 }
 0x3ca   :  { %v3649_v29 = vrot.slane %v3948_v1, 2 }
 0x3cc   :  { %v3651_v3 = vsel %vm3638_vm0, %v3649_v29, 0.0 }
 0x3cd   :  { %v3652_v14 = vrot.slane %v3651_v3, 4 }
 0x3cf   :  { %v3653_v16 = vadd.f32 %v3652_v14, %v3651_v3 }
 0x3d1   :  { %v3654_v6 = vrot.slane %v3653_v16, 2 }
 0x3d3   :  { %v3655_v62 = vadd.f32 %v3654_v6, %v3653_v16 }
 0x3d5   :  { %v3656_v47 = vrot.slane %v3655_v62, 1 }
 0x3d7   :  { %v3657_v42 = vadd.f32 %v3656_v47, %v3655_v62 }
 0x3d9   :  { %3659 = vst.msk [vmem:[%s6241_s7] sm:$0x1] %vm3658_vm1, %v3657_v42 }

</bundles_post_ra>
